<compile_context>
chip_gen: v7x
topology: tpu7x:2x2x1
jax: 0.10.0
libtpu: 0.0.40
codegen_flags: <defaults>
</compile_context>

<pallas_src>
import jax
import jax.numpy as jnp
from jax.experimental import pallas as pl
from jax.experimental.pallas import tpu as pltpu

D_IN, D_HID, D_OUT = 1536, 512, 128


def _cdiv(a, b):
    return -(-a // b)


def _round_up(n, m):
    return ((n + m - 1) // m) * m


def ffn_kernel(x_ref, w1_ref, b1_ref, w2_ref, b2_ref, o_ref):
    # In-kernel cast of the activation tile to the MXU compute dtype (bf16).
    x = x_ref[...].astype(w1_ref.dtype)
    # Layer 1: (tm, 1536) @ (1536, 512) -> f32 accumulate; bias + tanh in f32.
    h = jnp.dot(x, w1_ref[...], preferred_element_type=jnp.float32)
    h = jnp.tanh(h + b1_ref[...])
    # Layer 2: cast activations back to the compute dtype for the MXU; f32 accumulate.
    y = jnp.dot(h.astype(w2_ref.dtype), w2_ref[...],
                preferred_element_type=jnp.float32)
    o_ref[...] = jnp.tanh(y + b2_ref[...]).astype(o_ref.dtype)


def prepare_ffn_params(w1, b1, w2, b2, compute_dtype=jnp.bfloat16):
    """One-time conversion of PyTorch-style params to kernel layout/dtypes.

    w1: (1536, 512), b1: (512,), w2: (512, 128), b2: (128,)  (weights already
    stored as (in_features, out_features)). Call once; reuse the result across
    ffn_hete calls so weight casting never sits on the per-call path.
    """
    return (w1.astype(compute_dtype),
            b1.reshape(1, D_HID).astype(jnp.float32),
            w2.astype(compute_dtype),
            b2.reshape(1, D_OUT).astype(jnp.float32))


def _choose_tile(batch, tm):
    """Balanced batch tile, multiple of 8 sublanes.

    - Spreads padding across grid steps (tail tile is ~full) instead of
      rounding the batch up to a full multiple of tm.
    - Forces >=2 grid steps whenever the batch justifies it (B >= 16) so the
      "parallel" grid axis can be sharded across both v7x TensorCores.
    """
    steps = _cdiv(batch, tm)
    if batch >= 16:
        steps = max(steps, 2)
    tm_eff = min(_round_up(_cdiv(batch, steps), 8), _round_up(batch, 8))
    return tm_eff


def ffn_hete(x, w1_c, b1_2d, w2_c, b2_2d, *, tm=512):
    """x: (B, 1536) in any float dtype; params from prepare_ffn_params()."""
    B = x.shape[0]
    out_dtype = x.dtype
    compute_itemsize = jnp.dtype(w1_c.dtype).itemsize

    tm_eff = _choose_tile(B, tm)
    grid = (_cdiv(B, tm_eff),)

    cost = pl.CostEstimate(
        flops=2 * B * (D_IN * D_HID + D_HID * D_OUT),
        transcendentals=B * (D_HID + D_OUT),
        bytes_accessed=(B * D_IN * jnp.dtype(x.dtype).itemsize
                        + (D_IN * D_HID + D_HID * D_OUT) * compute_itemsize
                        + (D_HID + D_OUT) * 4
                        + B * D_OUT * jnp.dtype(out_dtype).itemsize),
    )

    return pl.pallas_call(
        ffn_kernel,
        out_shape=jax.ShapeDtypeStruct((B, D_OUT), out_dtype),
        grid_spec=pltpu.PrefetchScalarGridSpec(
            num_scalar_prefetch=0,
            grid=grid,
            in_specs=[
                pl.BlockSpec((tm_eff, D_IN), lambda i: (i, 0)),   # x tile (pipelined)
                pl.BlockSpec((D_IN, D_HID), lambda i: (0, 0)),    # W1 (resident)
                pl.BlockSpec((1, D_HID), lambda i: (0, 0)),       # b1
                pl.BlockSpec((D_HID, D_OUT), lambda i: (0, 0)),   # W2 (resident)
                pl.BlockSpec((1, D_OUT), lambda i: (0, 0)),       # b2
            ],
            out_specs=pl.BlockSpec((tm_eff, D_OUT), lambda i: (i, 0)),
        ),
        compiler_params=pltpu.CompilerParams(
            dimension_semantics=("parallel",),  # megacore sharding on v7x
        ),
        cost_estimate=cost,
    )(x, w1_c, b1_2d, w2_c, b2_2d)


def reference_f32(x, w1, b1, w2, b2):
    h = jnp.tanh(x @ w1 + b1)
    return jnp.tanh(h @ w2 + b2)


if __name__ == "__main__":
    key = jax.random.PRNGKey(0)
    k_x, k_w1, k_b1, k_w2, k_b2, k_x2 = jax.random.split(key, 6)

    # Deterministic init mimicking nn.Linear (uniform +/- 1/sqrt(fan_in)),
    # stored as (in_features, out_features) for the kernel.
    lim1 = 1.0 / jnp.sqrt(jnp.float32(D_IN))
    lim2 = 1.0 / jnp.sqrt(jnp.float32(D_HID))
    w1 = jax.random.uniform(k_w1, (D_IN, D_HID), jnp.float32, -lim1, lim1)
    b1 = jax.random.uniform(k_b1, (D_HID,), jnp.float32, -lim1, lim1)
    w2 = jax.random.uniform(k_w2, (D_HID, D_OUT), jnp.float32, -lim2, lim2)
    b2 = jax.random.uniform(k_b2, (D_OUT,), jnp.float32, -lim2, lim2)

    # One-time param preparation (cast to bf16 compute dtype, biases to f32 rows).
    params = prepare_ffn_params(w1, b1, w2, b2)

    # Small, tile-aligned batch (single grid step).
    B = 8
    x = jax.random.normal(k_x, (B, D_IN), dtype=jnp.float32)
    out = jax.block_until_ready(ffn_hete(x, *params))
    ref = reference_f32(x, w1, b1, w2, b2)
    assert out.shape == (B, D_OUT)
    # bf16 compute vs f32 reference: loosened tolerance.
    assert jnp.allclose(out, ref, atol=3e-2, rtol=3e-2), "mismatch vs f32 reference (B=8)"

    # Ragged batch (exercises balanced tiling + masked tail block: 20 -> 2 x 16-row tiles).
    B2 = 20
    x2 = jax.random.normal(k_x2, (B2, D_IN), dtype=jnp.float32)
    out2 = jax.block_until_ready(ffn_hete(x2, *params))
    ref2 = reference_f32(x2, w1, b1, w2, b2)
    assert out2.shape == (B2, D_OUT)
    assert jnp.allclose(out2, ref2, atol=3e-2, rtol=3e-2), "mismatch vs f32 reference (B=20)"

    print("KERNEL_OK")
</pallas_src>

<mosaic_0001>
module attributes {stable_mosaic.version = 11 : i64} {
  func.func @ffn_kernel(%arg0: i32, %arg1: memref<8x1536xf32, #tpu.memory_space<vmem>>, %arg2: memref<1536x512xbf16, #tpu.memory_space<vmem>>, %arg3: memref<1x512xf32, #tpu.memory_space<vmem>>, %arg4: memref<512x128xbf16, #tpu.memory_space<vmem>>, %arg5: memref<1x128xf32, #tpu.memory_space<vmem>>, %arg6: memref<8x128xf32, #tpu.memory_space<vmem>>) attributes {dimension_semantics = [#tpu.dimension_semantics<parallel>], iteration_bounds = array<i64: 1>, scalar_prefetch = 0 : i64, scratch_operands = 0 : i64, tpu.core_type = #tpu.core_type<tc>, window_params = [{transform_indices = @transform_0, window_bounds = array<i64: 8, 1536>}, {pipeline_mode = #tpu.pipeline_mode<synchronous>, transform_indices = @transform_1, window_bounds = array<i64: 1536, 512>}, {pipeline_mode = #tpu.pipeline_mode<synchronous>, transform_indices = @transform_2, window_bounds = array<i64: 1, 512>}, {pipeline_mode = #tpu.pipeline_mode<synchronous>, transform_indices = @transform_3, window_bounds = array<i64: 512, 128>}, {pipeline_mode = #tpu.pipeline_mode<synchronous>, transform_indices = @transform_4, window_bounds = array<i64: 1, 128>}, {transform_indices = @transform_5, window_bounds = array<i64: 8, 128>}]} {
    %c0 = arith.constant 0 : index
    %c0_0 = arith.constant 0 : index
    %0 = vector.load %arg1[%c0, %c0_0] : memref<8x1536xf32, #tpu.memory_space<vmem>>, vector<8x1536xf32>
    %1 = arith.truncf %0 : vector<8x1536xf32> to vector<8x1536xbf16>
    %c0_1 = arith.constant 0 : index
    %c0_2 = arith.constant 0 : index
    %2 = vector.load %arg2[%c0_1, %c0_2] : memref<1536x512xbf16, #tpu.memory_space<vmem>>, vector<1536x512xbf16>
    %cst = arith.constant dense<0.000000e+00> : vector<8x512xf32>
    %3 = tpu.matmul %1, %2, %cst {dimension_numbers = #tpu.dot_dimension_numbers<[1], [0], [0], [1], [0, 0, 1, 1], [], []>} : vector<8x1536xbf16>, vector<1536x512xbf16>, vector<8x512xf32> -> vector<8x512xf32>
    %c0_3 = arith.constant 0 : index
    %c0_4 = arith.constant 0 : index
    %4 = vector.load %arg3[%c0_3, %c0_4] : memref<1x512xf32, #tpu.memory_space<vmem>>, vector<1x512xf32>
    %5 = vector.broadcast %4 : vector<1x512xf32> to vector<8x512xf32>
    %6 = arith.addf %3, %5 : vector<8x512xf32>
    %7 = math.tanh %6 : vector<8x512xf32>
    %8 = arith.truncf %7 : vector<8x512xf32> to vector<8x512xbf16>
    %c0_5 = arith.constant 0 : index
    %c0_6 = arith.constant 0 : index
    %9 = vector.load %arg4[%c0_5, %c0_6] : memref<512x128xbf16, #tpu.memory_space<vmem>>, vector<512x128xbf16>
    %cst_7 = arith.constant dense<0.000000e+00> : vector<8x128xf32>
    %10 = tpu.matmul %8, %9, %cst_7 {dimension_numbers = #tpu.dot_dimension_numbers<[1], [0], [0], [1], [0, 0, 1, 1], [], []>} : vector<8x512xbf16>, vector<512x128xbf16>, vector<8x128xf32> -> vector<8x128xf32>
    %c0_8 = arith.constant 0 : index
    %c0_9 = arith.constant 0 : index
    %11 = vector.load %arg5[%c0_8, %c0_9] : memref<1x128xf32, #tpu.memory_space<vmem>>, vector<1x128xf32>
    %12 = vector.broadcast %11 : vector<1x128xf32> to vector<8x128xf32>
    %13 = arith.addf %10, %12 : vector<8x128xf32>
    %14 = math.tanh %13 : vector<8x128xf32>
    %c0_10 = arith.constant 0 : index
    %c0_11 = arith.constant 0 : index
    %15 = vector.load %arg6[%c0_10, %c0_11] : memref<8x128xf32, #tpu.memory_space<vmem>>, vector<8x128xf32>
    tpu.vector_store %arg6[%c0_10, %c0_11], %14 {strides = array<i32>} : memref<8x128xf32, #tpu.memory_space<vmem>>, vector<8x128xf32>,
    return
  }
  func.func @transform_0(%arg0: i32) -> (i32, i32) {
    %c0_i32 = arith.constant 0 : i32
    %c0_i32_0 = arith.constant 0 : i32
    return %arg0, %c0_i32 : i32, i32
  }
  func.func @transform_1(%arg0: i32) -> (i32, i32) {
    %c0_i32 = arith.constant 0 : i32
    %c0_i32_0 = arith.constant 0 : i32
    %c0_i32_1 = arith.constant 0 : i32
    return %c0_i32, %c0_i32_0 : i32, i32
  }
  func.func @transform_2(%arg0: i32) -> (i32, i32) {
    %c0_i32 = arith.constant 0 : i32
    %c0_i32_0 = arith.constant 0 : i32
    %c0_i32_1 = arith.constant 0 : i32
    return %c0_i32, %c0_i32_0 : i32, i32
  }
  func.func @transform_3(%arg0: i32) -> (i32, i32) {
    %c0_i32 = arith.constant 0 : i32
    %c0_i32_0 = arith.constant 0 : i32
    %c0_i32_1 = arith.constant 0 : i32
    return %c0_i32, %c0_i32_0 : i32, i32
  }
  func.func @transform_4(%arg0: i32) -> (i32, i32) {
    %c0_i32 = arith.constant 0 : i32
    %c0_i32_0 = arith.constant 0 : i32
    %c0_i32_1 = arith.constant 0 : i32
    return %c0_i32, %c0_i32_0 : i32, i32
  }
  func.func @transform_5(%arg0: i32) -> (i32, i32) {
    %c0_i32 = arith.constant 0 : i32
    %c0_i32_0 = arith.constant 0 : i32
    return %arg0, %c0_i32 : i32, i32
  }
}

</mosaic_0001>

<bundles_post_ra>
// kernel: tpu_custom_call.1
= control target key start
LH: loop header
LB: loop body
LE: loop exit
PB: predicated region body
PF: predicated region fallthrough
CT: control target
= control target key end

     0   :  { %10 = vsyncpa [#allocation3], 0  ;;  %s4681_s0 = inlined_call_operand.hbm [shape: f32[8,1536], index: 0, kind: input, shape index: {}]   ;;  %s4682_s1 = inlined_call_operand.hbm [shape: bf16[1536,512], index: 1, kind: input, shape index: {}]   ;;  %s4683_s2 = inlined_call_operand.hbm [shape: f32[1,512], index: 2, kind: input, shape index: {}]   ;;  %s4684_s3 = inlined_call_operand.hbm [shape: bf16[512,128], index: 3, kind: input, shape index: {}]   ;;  %s4685_s4 = inlined_call_operand.hbm [shape: f32[1,128], index: 4, kind: input, shape index: {}]   ;;  %s4686_s5 = inlined_call_operand.hbm [shape: f32[8,128], index: 5, kind: output, shape index: {}]  }
   0x1   :  { %11 = vsyncpa [#allocation6], 0 }
   0x2   :  { %12 = vsyncpa [#allocation9], 0 }
   0x3   :  { %13 = vsyncpa [#allocation4], 0  ;;  %s4569_s18 = smov [#allocation5]   ;;  %s4429_s22 = scalar_lea.hbm %s4682_s1, 49152 }
   0x4   :  { %s29_s19 = sshll.u32 %s4569_s18, 4  ;;  %p4430_p0 = scmp.ne.s32.totalorder %s4682_s1, %s4429_s22  ;;  %s30_s19 = int_to_ptr.vmem [resolvable:$true] %s29_s19 }
   0x5   :  { %p4433_p1 = scmp.lt.u32.totalorder %s4429_s22, %s4682_s1 }
   0x7   :  { %p4435_p2 = pnand %p4433_p1, %p4430_p0 }
   0x9   :  { %4438 = shalt.err (!%p4435_p2)
}
   0xa   :  { %s4439_s27 = scalar_lea.vmem %s30_s19, 49152  ;;  %p4444_p4 = scmp.lt.s32.totalorder %s30_s19, %s30_s19 }
   0xb   :  { %p4440_p3 = scmp.ne.s32.totalorder %s30_s19, %s4439_s27  ;;  %p4445_p5 = scmp.lt.s32.totalorder %s4439_s27, %s4439_s27 }
   0xd   :  { %p4446_p6 = por %p4445_p5, %p4444_p4 }
   0xf   :  { %p4447_p7 = pnand %p4446_p6, %p4440_p3 }
  0x11   :  { %4450 = shalt.err (!%p4447_p7)
}
  0x12   :  { %s4570_s28 = smov 256   ;;  %s4571_s29 = smov 16  }
  0x13   :  { %35 = dma.hbm_to_vmem [thread:$0]  %s4682_s1, 49152, %s30_s19, [#allocation6], %s4570_s28, %s4570_s28, %s4571_s29  }
  0x14   :  { %s4572_s7 = smov [#allocation8]   ;;  %s4451_s11 = scalar_lea.hbm %s4684_s3, 4096 }
  0x15   :  { %s51_s8 = sshll.u32 %s4572_s7, 4  ;;  %p4452_p8 = scmp.ne.s32.totalorder %s4684_s3, %s4451_s11  ;;  %s52_s8 = int_to_ptr.vmem [resolvable:$true] %s51_s8 }
  0x16   :  { %p4455_p9 = scmp.lt.u32.totalorder %s4451_s11, %s4684_s3 }
  0x18   :  { %p4457_p10 = pnand %p4455_p9, %p4452_p8 }
  0x1a   :  { %4460 = shalt.err (!%p4457_p10)
}
  0x1b   :  { %s4461_s16 = scalar_lea.vmem %s52_s8, 4096  ;;  %p4466_p12 = scmp.lt.s32.totalorder %s52_s8, %s52_s8 }
  0x1c   :  { %p4462_p11 = scmp.ne.s32.totalorder %s52_s8, %s4461_s16  ;;  %p4467_p13 = scmp.lt.s32.totalorder %s4461_s16, %s4461_s16 }
  0x1e   :  { %p4468_p0 = por %p4467_p13, %p4466_p12 }
  0x20   :  { %p4469_p1 = pnand %p4468_p0, %p4462_p11 }
  0x22   :  { %4472 = shalt.err (!%p4469_p1)
}
  0x23   :  { %s4573_s1 = smov 64   ;;  %s4574_s17 = smov 4  }
  0x24   :  { %57 = dma.hbm_to_vmem [thread:$0]  %s4684_s3, 4096, %s52_s8, [#allocation9], %s4573_s1, %s4573_s1, %s4574_s17  }
  0x25   :  { %s4575_s20 = smov [#allocation2]   ;;  %s4576_s22 = smov [#allocation7]  }
  0x26   :  { %s20_s21 = sshll.u32 %s4575_s20, 4  ;;  %s42_s23 = sshll.u32 %s4576_s22, 4  ;;  %s21_s21 = int_to_ptr.vmem [resolvable:$true] %s20_s21  ;;  %s43_s23 = int_to_ptr.vmem [resolvable:$true] %s42_s23 }
  0x27   :  { %s4473_s26 = scalar_lea.hbm %s4681_s0, 1536 }
  0x28   :  { %p4474_p2 = scmp.ne.s32.totalorder %s4681_s0, %s4473_s26  ;;  %p4477_p3 = scmp.lt.u32.totalorder %s4473_s26, %s4681_s0 }
  0x2a   :  { %p4479_p4 = pnand %p4477_p3, %p4474_p2 }
  0x2c   :  { %4482 = shalt.err (!%p4479_p4)
}
  0x2d   :  { %s4483_s3 = scalar_lea.vmem %s21_s21, 1536  ;;  %p4488_p6 = scmp.lt.s32.totalorder %s21_s21, %s21_s21 }
  0x2e   :  { %p4484_p5 = scmp.ne.s32.totalorder %s21_s21, %s4483_s3  ;;  %p4489_p7 = scmp.lt.s32.totalorder %s4483_s3, %s4483_s3 }
  0x30   :  { %p4490_p8 = por %p4489_p7, %p4488_p6 }
  0x32   :  { %p4491_p9 = pnand %p4490_p8, %p4484_p5 }
  0x34   :  { %4494 = shalt.err (!%p4491_p9)
}
  0x35   :  { %23 = dma.hbm_to_vmem [thread:$0]  %s4681_s0, 1536, %s21_s21, [#allocation3]  }
  0x36   :  { %s4495_s10 = scalar_lea.hbm %s4683_s2, 64 }
  0x37   :  { %p4496_p10 = scmp.ne.s32.totalorder %s4683_s2, %s4495_s10  ;;  %p4499_p11 = scmp.lt.u32.totalorder %s4495_s10, %s4683_s2 }
  0x39   :  { %p4501_p12 = pnand %p4499_p11, %p4496_p10 }
  0x3b   :  { %4504 = shalt.err (!%p4501_p12)
}
  0x3c   :  { %s4505_s15 = scalar_lea.vmem %s43_s23, 64  ;;  %p4510_p0 = scmp.lt.s32.totalorder %s43_s23, %s43_s23 }
  0x3d   :  { %p4506_p13 = scmp.ne.s32.totalorder %s43_s23, %s4505_s15  ;;  %p4511_p1 = scmp.lt.s32.totalorder %s4505_s15, %s4505_s15 }
  0x3f   :  { %p4512_p2 = por %p4511_p1, %p4510_p0 }
  0x41   :  { %p4513_p3 = pnand %p4512_p2, %p4506_p13 }
  0x43   :  { %4516 = shalt.err (!%p4513_p3)
}
  0x44   :  { %45 = dma.hbm_to_vmem [thread:$0]  %s4683_s2, 64, %s43_s23, [#allocation6]  }
  0x45   :  { %s4577_s1 = smov [#allocation10]   ;;  %s4517_s20 = scalar_lea.hbm %s4685_s4, 16 }
  0x46   :  { %s64_s17 = sshll.u32 %s4577_s1, 4  ;;  %p4518_p4 = scmp.ne.s32.totalorder %s4685_s4, %s4517_s20  ;;  %s65_s17 = int_to_ptr.vmem [resolvable:$true] %s64_s17 }
  0x47   :  { %p4521_p5 = scmp.lt.u32.totalorder %s4517_s20, %s4685_s4 }
  0x49   :  { %p4523_p6 = pnand %p4521_p5, %p4518_p4 }
  0x4b   :  { %4526 = shalt.err (!%p4523_p6)
}
  0x4c   :  { %s4527_s26 = scalar_lea.vmem %s65_s17, 16  ;;  %s4531_s2 = scalar_lea.vmem %s65_s17, 32 }
  0x4d   :  { %p4528_p7 = scmp.ne.s32.totalorder %s65_s17, %s4527_s26  ;;  %p4532_p8 = scmp.lt.s32.totalorder %s65_s17, %s65_s17 }
  0x4e   :  { %p4533_p9 = scmp.lt.s32.totalorder %s4531_s2, %s4527_s26 }
  0x50   :  { %p4534_p10 = por %p4533_p9, %p4532_p8 }
  0x52   :  { %p4535_p11 = pnand %p4534_p10, %p4528_p7 }
  0x54   :  { %4538 = shalt.err (!%p4535_p11)
}
  0x55   :  { %67 = dma.hbm_to_vmem [thread:$0]  %s4685_s4, 16, %s65_s17, [#allocation9]  }
  0x56   :  { %4561 = dma.done.wait [#allocation3], 1536  }
  0x57   :  { %4562 = vsyncadd [#allocation3], 4294965760 }
  0x58   :  { %4563 = dma.done.wait [#allocation6], 49216  }
  0x59   :  { %4564 = vsyncadd [#allocation6], 4294918080 }
  0x5a   :  { %4565 = dma.done.wait [#allocation9], 4112  }
  0x5b   :  { %4566 = vsyncadd [#allocation9], 4294963184  ;;  %v3811_v0 = vld [vmem:[#allocation5 + $0x4] ss:$16 sps:$4 sm:$0xff]   ;;  %v3813_v1 = vld [vmem:[#allocation5 + $0xc] ss:$16 sps:$4 sm:$0xff]  }
  0x5c   :  { %2434 = vmatprep.subr.bf16.mxu0 %v3811_v0  ;;  %v3815_v2 = vld [vmem:[#allocation5] ss:$16 sps:$4 sm:$0xff]   ;;  %v3816_v3 = vld [vmem:[#allocation5 + $0x8] ss:$16 sps:$4 sm:$0xff]   ;;  %2680 = vmatprep.subr.bf16.mxu1 %v3813_v1  ;;  %v3817_v4 = vld [vmem:[#allocation5 + $0x24] ss:$16 sps:$4 sm:$0xff]  }
  0x5d   :  { %2435 = vmatpush1.bf16.msra.mxu0 %v3815_v2  ;;  %2681 = vmatpush1.bf16.msra.mxu1 %v3816_v3  ;;  %v3819_v5 = vld [vmem:[#allocation5 + $0x2c] ss:$16 sps:$4 sm:$0xff]   ;;  %v3821_v6 = vld [vmem:[#allocation5 + $0x20] ss:$16 sps:$4 sm:$0xff]   ;;  %v3822_v7 = vld [vmem:[#allocation5 + $0x28] ss:$16 sps:$4 sm:$0xff]  }
  0x5e   :  { %2436 = vmatprep.subr.bf16.mxu0 %v3817_v4  ;;  %2682 = vmatprep.subr.bf16.mxu1 %v3819_v5  ;;  %v3823_v8 = vld [vmem:[#allocation5 + $0x44] ss:$16 sps:$4 sm:$0xff]   ;;  %v3825_v9 = vld [vmem:[#allocation5 + $0x4c] ss:$16 sps:$4 sm:$0xff]   ;;  %v3827_v10 = vld [vmem:[#allocation5 + $0x40] ss:$16 sps:$4 sm:$0xff]  }
  0x5f   :  { %v3828_v11 = vld [vmem:[#allocation5 + $0x48] ss:$16 sps:$4 sm:$0xff]   ;;  %v3829_v12 = vld [vmem:[#allocation5 + $0x64] ss:$16 sps:$4 sm:$0xff]   ;;  %v3831_v13 = vld [vmem:[#allocation5 + $0x6c] ss:$16 sps:$4 sm:$0xff]  }
  0x60   :  { %v3833_v14 = vld [vmem:[#allocation5 + $0x60] ss:$16 sps:$4 sm:$0xff]   ;;  %v3834_v15 = vld [vmem:[#allocation5 + $0x68] ss:$16 sps:$4 sm:$0xff]   ;;  %v3835_v16 = vld [vmem:[#allocation5 + $0x84] ss:$16 sps:$4 sm:$0xff]  }
  0x61   :  { %2437 = vmatpush1.bf16.msra.mxu0 %v3821_v6  ;;  %2683 = vmatpush1.bf16.msra.mxu1 %v3822_v7  ;;  %v3837_v17 = vld [vmem:[#allocation5 + $0x8c] ss:$16 sps:$4 sm:$0xff]   ;;  %v3839_v18 = vld [vmem:[#allocation5 + $0x80] ss:$16 sps:$4 sm:$0xff]   ;;  %v3840_v19 = vld [vmem:[#allocation5 + $0x88] ss:$16 sps:$4 sm:$0xff]  }
  0x62   :  { %2438 = vmatprep.subr.bf16.mxu0 %v3823_v8  ;;  %2684 = vmatprep.subr.bf16.mxu1 %v3825_v9  ;;  %v3841_v20 = vld [vmem:[#allocation5 + $0xa4] ss:$16 sps:$4 sm:$0xff]   ;;  %v3843_v21 = vld [vmem:[#allocation5 + $0xac] ss:$16 sps:$4 sm:$0xff]   ;;  %v3845_v22 = vld [vmem:[#allocation5 + $0xa0] ss:$16 sps:$4 sm:$0xff]  }
  0x63   :  { %v3846_v23 = vld [vmem:[#allocation5 + $0xa8] ss:$16 sps:$4 sm:$0xff]   ;;  %v3847_v24 = vld [vmem:[#allocation5 + $0xc4] ss:$16 sps:$4 sm:$0xff]   ;;  %v3849_v25 = vld [vmem:[#allocation5 + $0xcc] ss:$16 sps:$4 sm:$0xff]  }
  0x64   :  { %v3851_v26 = vld [vmem:[#allocation5 + $0xc0] ss:$16 sps:$4 sm:$0xff]   ;;  %v3852_v27 = vld [vmem:[#allocation5 + $0xc8] ss:$16 sps:$4 sm:$0xff]   ;;  %v3853_v28 = vld [vmem:[#allocation5 + $0xe4] ss:$16 sps:$4 sm:$0xff]  }
  0x65   :  { %2439 = vmatpush1.bf16.msra.mxu0 %v3827_v10  ;;  %2685 = vmatpush1.bf16.msra.mxu1 %v3828_v11  ;;  %v3855_v29 = vld [vmem:[#allocation5 + $0xec] ss:$16 sps:$4 sm:$0xff]   ;;  %v3857_v30 = vld [vmem:[#allocation5 + $0xe0] ss:$16 sps:$4 sm:$0xff]   ;;  %v3858_v31 = vld [vmem:[#allocation5 + $0xe8] ss:$16 sps:$4 sm:$0xff]  }
  0x66   :  { %2440 = vmatprep.subr.bf16.mxu0 %v3829_v12  ;;  %2686 = vmatprep.subr.bf16.mxu1 %v3831_v13  ;;  %v3859_v32 = vld [vmem:[#allocation5 + $0x104] ss:$16 sps:$4 sm:$0xff]   ;;  %v3861_v33 = vld [vmem:[#allocation5 + $0x10c] ss:$16 sps:$4 sm:$0xff]   ;;  %v3863_v34 = vld [vmem:[#allocation5 + $0x100] ss:$16 sps:$4 sm:$0xff]  }
  0x67   :  { %v3864_v35 = vld [vmem:[#allocation5 + $0x108] ss:$16 sps:$4 sm:$0xff]   ;;  %v3865_v36 = vld [vmem:[#allocation5 + $0x124] ss:$16 sps:$4 sm:$0xff]   ;;  %v3867_v37 = vld [vmem:[#allocation5 + $0x12c] ss:$16 sps:$4 sm:$0xff]  }
  0x68   :  { %v3869_v38 = vld [vmem:[#allocation5 + $0x120] ss:$16 sps:$4 sm:$0xff]   ;;  %v3870_v39 = vld [vmem:[#allocation5 + $0x128] ss:$16 sps:$4 sm:$0xff]   ;;  %v3871_v40 = vld [vmem:[#allocation5 + $0x144] ss:$16 sps:$4 sm:$0xff]  }
  0x69   :  { %2441 = vmatpush1.bf16.msra.mxu0 %v3833_v14  ;;  %2687 = vmatpush1.bf16.msra.mxu1 %v3834_v15  ;;  %v3873_v41 = vld [vmem:[#allocation5 + $0x14c] ss:$16 sps:$4 sm:$0xff]   ;;  %v3875_v42 = vld [vmem:[#allocation5 + $0x140] ss:$16 sps:$4 sm:$0xff]   ;;  %v3876_v43 = vld [vmem:[#allocation5 + $0x148] ss:$16 sps:$4 sm:$0xff]  }
  0x6a   :  { %2442 = vmatprep.subr.bf16.mxu0 %v3835_v16  ;;  %2688 = vmatprep.subr.bf16.mxu1 %v3837_v17  ;;  %v3877_v44 = vld [vmem:[#allocation5 + $0x164] ss:$16 sps:$4 sm:$0xff]   ;;  %v3879_v45 = vld [vmem:[#allocation5 + $0x16c] ss:$16 sps:$4 sm:$0xff]   ;;  %v3881_v47 = vld [vmem:[#allocation5 + $0x160] ss:$16 sps:$4 sm:$0xff]  }
  0x6b   :  { %v85_v46 = vld [vmem:[#allocation2 + $0x8] sm:$0xff]  ;;  %v3883_v50 = vld [vmem:[#allocation5 + $0x184] ss:$16 sps:$4 sm:$0xff]   ;;  %v3887_v52 = vld [vmem:[#allocation5 + $0x180] ss:$16 sps:$4 sm:$0xff]   ;;  %s4578_s4 = smov [#allocation11]  }
  0x6c   :  { %v97_v48 = vpack.c.bf16 %v85_v46, %v85_v46  ;;  %v3882_v49 = vld [vmem:[#allocation5 + $0x168] ss:$16 sps:$4 sm:$0xff]   ;;  %v3885_v51 = vld [vmem:[#allocation5 + $0x18c] ss:$16 sps:$4 sm:$0xff]   ;;  %v3889_v54 = vld [vmem:[#allocation5 + $0x1a4] ss:$16 sps:$4 sm:$0xff]  }
  0x6d   :  { %2443 = vmatpush1.bf16.msra.mxu0 %v3839_v18  ;;  %2689 = vmatpush1.bf16.msra.mxu1 %v3840_v19  ;;  %v3888_v53 = vld [vmem:[#allocation5 + $0x188] ss:$16 sps:$4 sm:$0xff]   ;;  %v3891_v55 = vld [vmem:[#allocation5 + $0x1ac] ss:$16 sps:$4 sm:$0xff]   ;;  %v3893_v56 = vld [vmem:[#allocation5 + $0x1a0] ss:$16 sps:$4 sm:$0xff]  }
  0x6e   :  { %2444 = vmatprep.subr.bf16.mxu0 %v3841_v20  ;;  %2690 = vmatprep.subr.bf16.mxu1 %v3843_v21  ;;  %v3894_v57 = vld [vmem:[#allocation5 + $0x1a8] ss:$16 sps:$4 sm:$0xff]   ;;  %v3895_v58 = vld [vmem:[#allocation5 + $0x1c4] ss:$16 sps:$4 sm:$0xff]   ;;  %v3897_v59 = vld [vmem:[#allocation5 + $0x1cc] ss:$16 sps:$4 sm:$0xff]  }
  0x6f   :  { %2466 = vmatprep.mubr.bf16.mxu0 %v97_v48  ;;  %2712 = vmatprep.mubr.bf16.mxu1 %v97_v48  ;;  %v3899_v60 = vld [vmem:[#allocation5 + $0x1c0] ss:$16 sps:$4 sm:$0xff]   ;;  %v3900_v61 = vld [vmem:[#allocation5 + $0x1c8] ss:$16 sps:$4 sm:$0xff]   ;;  %v3901_v62 = vld [vmem:[#allocation5 + $0x1e4] ss:$16 sps:$4 sm:$0xff]  }
  0x70   :  { %v3903_v63 = vld [vmem:[#allocation5 + $0x1ec] ss:$16 sps:$4 sm:$0xff]   ;;  %v3905_v0 = vld [vmem:[#allocation5 + $0x1e0] ss:$16 sps:$4 sm:$0xff]   ;;  %v3906_v1 = vld [vmem:[#allocation5 + $0x1e8] ss:$16 sps:$4 sm:$0xff]  }
  0x71   :  { %2445 = vmatpush1.bf16.msra.mxu0 %v3845_v22  ;;  %2691 = vmatpush1.bf16.msra.mxu1 %v3846_v23  ;;  %v84_v2 = vld [vmem:[#allocation2] sm:$0xff]  ;;  %v3912_v4 = vld [vmem:[#allocation5 + $0x20c] ss:$16 sps:$4 sm:$0xff]   ;;  %v3910_v7 = vld [vmem:[#allocation5 + $0x208] ss:$16 sps:$4 sm:$0xff]   ;;  %s3285_s28 = sshll.u32 %s4578_s4, 4  ;;  %s3286_s28 = int_to_ptr.vmem [resolvable:$true] %s3285_s28 }
  0x72   :  { %2446 = vmatprep.subr.bf16.mxu0 %v3847_v24  ;;  %2692 = vmatprep.subr.bf16.mxu1 %v3849_v25  ;;  %v3909_v3 = vld [vmem:[#allocation5 + $0x204] ss:$16 sps:$4 sm:$0xff]   ;;  %v96_v5 = vpack.c.bf16 %v84_v2, %v84_v2  ;;  %v3907_v6 = vld [vmem:[#allocation5 + $0x200] ss:$16 sps:$4 sm:$0xff]   ;;  %v3918_v9 = vld [vmem:[#allocation5 + $0x22c] ss:$16 sps:$4 sm:$0xff]   ;;  %p4544_p13 = scmp.lt.s32.totalorder %s3286_s28, %s3286_s28 }
  0x73   :  { %v3915_v8 = vld [vmem:[#allocation5 + $0x224] ss:$16 sps:$4 sm:$0xff]   ;;  %v3913_v10 = vld [vmem:[#allocation5 + $0x220] ss:$16 sps:$4 sm:$0xff]   ;;  %v3916_v11 = vld [vmem:[#allocation5 + $0x228] ss:$16 sps:$4 sm:$0xff]  }
  0x74   :  { %v3921_v12 = vld [vmem:[#allocation5 + $0x244] ss:$16 sps:$4 sm:$0xff]   ;;  %v3924_v13 = vld [vmem:[#allocation5 + $0x24c] ss:$16 sps:$4 sm:$0xff]   ;;  %v3919_v14 = vld [vmem:[#allocation5 + $0x240] ss:$16 sps:$4 sm:$0xff]  }
  0x75   :  { %2447 = vmatpush1.bf16.msra.mxu0 %v3851_v26  ;;  %2693 = vmatpush1.bf16.msra.mxu1 %v3852_v27  ;;  %v3922_v15 = vld [vmem:[#allocation5 + $0x248] ss:$16 sps:$4 sm:$0xff]   ;;  %v3927_v16 = vld [vmem:[#allocation5 + $0x264] ss:$16 sps:$4 sm:$0xff]   ;;  %v3930_v17 = vld [vmem:[#allocation5 + $0x26c] ss:$16 sps:$4 sm:$0xff]  }
  0x76   :  { %2448 = vmatprep.subr.bf16.mxu0 %v3853_v28  ;;  %2694 = vmatprep.subr.bf16.mxu1 %v3855_v29  ;;  %v3925_v18 = vld [vmem:[#allocation5 + $0x260] ss:$16 sps:$4 sm:$0xff]   ;;  %v3928_v19 = vld [vmem:[#allocation5 + $0x268] ss:$16 sps:$4 sm:$0xff]   ;;  %v3933_v20 = vld [vmem:[#allocation5 + $0x284] ss:$16 sps:$4 sm:$0xff]  }
  0x77   :  { %v3936_v21 = vld [vmem:[#allocation5 + $0x28c] ss:$16 sps:$4 sm:$0xff]   ;;  %v3931_v22 = vld [vmem:[#allocation5 + $0x280] ss:$16 sps:$4 sm:$0xff]   ;;  %v3934_v23 = vld [vmem:[#allocation5 + $0x288] ss:$16 sps:$4 sm:$0xff]  }
  0x78   :  { %v3939_v24 = vld [vmem:[#allocation5 + $0x2a4] ss:$16 sps:$4 sm:$0xff]   ;;  %v3942_v25 = vld [vmem:[#allocation5 + $0x2ac] ss:$16 sps:$4 sm:$0xff]   ;;  %v3937_v26 = vld [vmem:[#allocation5 + $0x2a0] ss:$16 sps:$4 sm:$0xff]  }
  0x79   :  { %2449 = vmatpush1.bf16.msra.mxu0 %v3857_v30  ;;  %2695 = vmatpush1.bf16.msra.mxu1 %v3858_v31  ;;  %v3940_v27 = vld [vmem:[#allocation5 + $0x2a8] ss:$16 sps:$4 sm:$0xff]   ;;  %v3945_v28 = vld [vmem:[#allocation5 + $0x2c4] ss:$16 sps:$4 sm:$0xff]   ;;  %v3948_v29 = vld [vmem:[#allocation5 + $0x2cc] ss:$16 sps:$4 sm:$0xff]  }
  0x7a   :  { %2450 = vmatprep.subr.bf16.mxu0 %v3859_v32  ;;  %2696 = vmatprep.subr.bf16.mxu1 %v3861_v33  ;;  %v87_v30 = vld [vmem:[#allocation2 + $0x18] sm:$0xff]  ;;  %v3943_v31 = vld [vmem:[#allocation5 + $0x2c0] ss:$16 sps:$4 sm:$0xff]   ;;  %v3969_v46 = vld [vmem:[#allocation5 + $0x344] ss:$16 sps:$4 sm:$0xff]   ;;  %s4539_s29 = scalar_lea.vmem %s3286_s28, 128 }
  0x7b   :  { %v99_v32 = vpack.c.bf16 %v87_v30, %v87_v30  ;;  %v3946_v33 = vld [vmem:[#allocation5 + $0x2c8] ss:$16 sps:$4 sm:$0xff]   ;;  %v3967_v48 = vld [vmem:[#allocation5 + $0x340] ss:$16 sps:$4 sm:$0xff]   ;;  %v3999_v2 = vld [vmem:[#allocation5 + $0x3e4] ss:$16 sps:$4 sm:$0xff]   ;;  %p4540_p12 = scmp.ne.s32.totalorder %s3286_s28, %s4539_s29  ;;  %p4545_p0 = scmp.lt.s32.totalorder %s4539_s29, %s4539_s29 }
  0x7c   :  { %v4035_v30 = vld [vmem:[#allocation5 + $0x4a4] ss:$16 sps:$4 sm:$0xff]  }
  0x7d   :  { %2451 = vmatpush1.bf16.msra.mxu0 %v3863_v34  ;;  %2697 = vmatpush1.bf16.msra.mxu1 %v3864_v35  ;;  %v3951_v34 = vld [vmem:[#allocation5 + $0x2e4] ss:$16 sps:$4 sm:$0xff]   ;;  %v3954_v35 = vld [vmem:[#allocation5 + $0x2ec] ss:$16 sps:$4 sm:$0xff]   ;;  %p4546_p1 = por %p4545_p0, %p4544_p13 }
  0x7e   :  { %2452 = vmatprep.subr.bf16.mxu0 %v3865_v36  ;;  %2698 = vmatprep.subr.bf16.mxu1 %v3867_v37  ;;  %v3949_v36 = vld [vmem:[#allocation5 + $0x2e0] ss:$16 sps:$4 sm:$0xff]   ;;  %v3952_v37 = vld [vmem:[#allocation5 + $0x2e8] ss:$16 sps:$4 sm:$0xff]  }
  0x7f   :  { %p4547_p2 = pnand %p4546_p1, %p4540_p12 }
  0x81   :  { %2453 = vmatpush1.bf16.msra.mxu0 %v3869_v38  ;;  %2699 = vmatpush1.bf16.msra.mxu1 %v3870_v39  ;;  %v3957_v38 = vld [vmem:[#allocation5 + $0x304] ss:$16 sps:$4 sm:$0xff]   ;;  %v3960_v39 = vld [vmem:[#allocation5 + $0x30c] ss:$16 sps:$4 sm:$0xff]  }
  0x82   :  { %2454 = vmatprep.subr.bf16.mxu0 %v3871_v40  ;;  %2700 = vmatprep.subr.bf16.mxu1 %v3873_v41  ;;  %v3955_v40 = vld [vmem:[#allocation5 + $0x300] ss:$16 sps:$4 sm:$0xff]   ;;  %v3958_v41 = vld [vmem:[#allocation5 + $0x308] ss:$16 sps:$4 sm:$0xff]  }
  0x85   :  { %2455 = vmatpush1.bf16.msra.mxu0 %v3875_v42  ;;  %2701 = vmatpush1.bf16.msra.mxu1 %v3876_v43  ;;  %v3963_v42 = vld [vmem:[#allocation5 + $0x324] ss:$16 sps:$4 sm:$0xff]   ;;  %v3966_v43 = vld [vmem:[#allocation5 + $0x32c] ss:$16 sps:$4 sm:$0xff]  }
  0x86   :  { %2456 = vmatprep.subr.bf16.mxu0 %v3877_v44  ;;  %2702 = vmatprep.subr.bf16.mxu1 %v3879_v45  ;;  %v3961_v44 = vld [vmem:[#allocation5 + $0x320] ss:$16 sps:$4 sm:$0xff]   ;;  %v3964_v45 = vld [vmem:[#allocation5 + $0x328] ss:$16 sps:$4 sm:$0xff]  }
  0x89   :  { %2457 = vmatpush1.bf16.msra.mxu0 %v3881_v47  ;;  %2703 = vmatpush1.bf16.msra.mxu1 %v3882_v49  ;;  %v3972_v47 = vld [vmem:[#allocation5 + $0x34c] ss:$16 sps:$4 sm:$0xff]   ;;  %v3970_v49 = vld [vmem:[#allocation5 + $0x348] ss:$16 sps:$4 sm:$0xff]  }
  0x8a   :  { %2458 = vmatprep.subr.bf16.mxu0 %v3883_v50  ;;  %2704 = vmatprep.subr.bf16.mxu1 %v3885_v51  ;;  %v3975_v50 = vld [vmem:[#allocation5 + $0x364] ss:$16 sps:$4 sm:$0xff]   ;;  %v3978_v51 = vld [vmem:[#allocation5 + $0x36c] ss:$16 sps:$4 sm:$0xff]  }
  0x8d   :  { %2459 = vmatpush1.bf16.msra.mxu0 %v3887_v52  ;;  %2705 = vmatpush1.bf16.msra.mxu1 %v3888_v53  ;;  %v3973_v52 = vld [vmem:[#allocation5 + $0x360] ss:$16 sps:$4 sm:$0xff]   ;;  %v3976_v53 = vld [vmem:[#allocation5 + $0x368] ss:$16 sps:$4 sm:$0xff]  }
  0x8e   :  { %2460 = vmatprep.subr.bf16.mxu0 %v3889_v54  ;;  %2706 = vmatprep.subr.bf16.mxu1 %v3891_v55  ;;  %v3981_v54 = vld [vmem:[#allocation5 + $0x384] ss:$16 sps:$4 sm:$0xff]   ;;  %v3984_v55 = vld [vmem:[#allocation5 + $0x38c] ss:$16 sps:$4 sm:$0xff]  }
  0x91   :  { %2461 = vmatpush1.bf16.msra.mxu0 %v3893_v56  ;;  %2707 = vmatpush1.bf16.msra.mxu1 %v3894_v57  ;;  %v3979_v56 = vld [vmem:[#allocation5 + $0x380] ss:$16 sps:$4 sm:$0xff]   ;;  %v3982_v57 = vld [vmem:[#allocation5 + $0x388] ss:$16 sps:$4 sm:$0xff]  }
  0x92   :  { %2462 = vmatprep.subr.bf16.mxu0 %v3895_v58  ;;  %2708 = vmatprep.subr.bf16.mxu1 %v3897_v59  ;;  %v3987_v58 = vld [vmem:[#allocation5 + $0x3a4] ss:$16 sps:$4 sm:$0xff]   ;;  %v3990_v59 = vld [vmem:[#allocation5 + $0x3ac] ss:$16 sps:$4 sm:$0xff]  }
  0x95   :  { %2463 = vmatpush1.bf16.msra.mxu0 %v3899_v60  ;;  %2709 = vmatpush1.bf16.msra.mxu1 %v3900_v61  ;;  %v3985_v60 = vld [vmem:[#allocation5 + $0x3a0] ss:$16 sps:$4 sm:$0xff]   ;;  %v3988_v61 = vld [vmem:[#allocation5 + $0x3a8] ss:$16 sps:$4 sm:$0xff]  }
  0x96   :  { %2464 = vmatprep.subr.bf16.mxu0 %v3901_v62  ;;  %2710 = vmatprep.subr.bf16.mxu1 %v3903_v63  ;;  %v3993_v62 = vld [vmem:[#allocation5 + $0x3c4] ss:$16 sps:$4 sm:$0xff]   ;;  %v3996_v63 = vld [vmem:[#allocation5 + $0x3cc] ss:$16 sps:$4 sm:$0xff]  }
  0x99   :  { %2465 = vmatpush1.bf16.msra.mxu0 %v3905_v0  ;;  %2711 = vmatpush1.bf16.msra.mxu1 %v3906_v1  ;;  %v3991_v0 = vld [vmem:[#allocation5 + $0x3c0] ss:$16 sps:$4 sm:$0xff]   ;;  %v3994_v1 = vld [vmem:[#allocation5 + $0x3c8] ss:$16 sps:$4 sm:$0xff]  }
  0x9a   :  { %2475 = vmatprep.subr.bf16.mxu0 %v3909_v3  ;;  %2721 = vmatprep.subr.bf16.mxu1 %v3912_v4  ;;  %v4002_v3 = vld [vmem:[#allocation5 + $0x3ec] ss:$16 sps:$4 sm:$0xff]   ;;  %v3997_v4 = vld [vmem:[#allocation5 + $0x3e0] ss:$16 sps:$4 sm:$0xff]  }
  0x9c   :  { %2467 = vmatmul.mubr.bf16.vlgmr.msra.gmra.mrb[0].mxu0 %v96_v5  ;;  %2713 = vmatmul.mubr.bf16.vlgmr.msra.gmra.mrb[0].mxu1 %v96_v5  ;;  %v4000_v5 = vld [vmem:[#allocation5 + $0x3e8] ss:$16 sps:$4 sm:$0xff]  }
  0x9d   :  { %2476 = vmatpush1.bf16.msra.mxu0 %v3907_v6  ;;  %2722 = vmatpush1.bf16.msra.mxu1 %v3910_v7  ;;  %v4005_v6 = vld [vmem:[#allocation5 + $0x404] ss:$16 sps:$4 sm:$0xff]  }
  0x9e   :  { %2477 = vmatprep.subr.bf16.mxu0 %v3915_v8  ;;  %2723 = vmatprep.subr.bf16.mxu1 %v3918_v9  ;;  %v86_v7 = vld [vmem:[#allocation2 + $0x10] sm:$0xff]  ;;  %v4008_v8 = vld [vmem:[#allocation5 + $0x40c] ss:$16 sps:$4 sm:$0xff]  }
  0x9f   :  { %2507 = vmatprep.mubr.bf16.mxu0 %v99_v32  ;;  %2753 = vmatprep.mubr.bf16.mxu1 %v99_v32  ;;  %v4003_v9 = vld [vmem:[#allocation5 + $0x400] ss:$16 sps:$4 sm:$0xff]  }
  0xa0   :  { %v4033_v32 = vld [vmem:[#allocation5 + $0x4a0] ss:$16 sps:$4 sm:$0xff]  }
  0xa1   :  { %2478 = vmatpush1.bf16.msra.mxu0 %v3913_v10  ;;  %2724 = vmatpush1.bf16.msra.mxu1 %v3916_v11  ;;  %v4006_v10 = vld [vmem:[#allocation5 + $0x408] ss:$16 sps:$4 sm:$0xff]   ;;  %v98_v11 = vpack.c.bf16 %v86_v7, %v86_v7  ;;  %v4098_v7 = vld [vmem:[#allocation5 + $0x5ec] ss:$16 sps:$4 sm:$0xff]  }
  0xa2   :  { %2479 = vmatprep.subr.bf16.mxu0 %v3921_v12  ;;  %2725 = vmatprep.subr.bf16.mxu1 %v3924_v13  ;;  %v4011_v12 = vld [vmem:[#allocation5 + $0x424] ss:$16 sps:$4 sm:$0xff]   ;;  %v4014_v13 = vld [vmem:[#allocation5 + $0x42c] ss:$16 sps:$4 sm:$0xff]  }
  0xa5   :  { %2480 = vmatpush1.bf16.msra.mxu0 %v3919_v14  ;;  %2726 = vmatpush1.bf16.msra.mxu1 %v3922_v15  ;;  %v89_v14 = vld [vmem:[#allocation2 + $0x28] sm:$0xff] }
  0xa6   :  { %2481 = vmatprep.subr.bf16.mxu0 %v3927_v16  ;;  %2727 = vmatprep.subr.bf16.mxu1 %v3930_v17  ;;  %v101_v15 = vpack.c.bf16 %v89_v14, %v89_v14  ;;  %v4009_v16 = vld [vmem:[#allocation5 + $0x420] ss:$16 sps:$4 sm:$0xff]   ;;  %v4012_v17 = vld [vmem:[#allocation5 + $0x428] ss:$16 sps:$4 sm:$0xff]  }
  0xa7   :  { %v4102_v14 = vld [vmem:[#allocation5 + $0x608] ss:$16 sps:$4 sm:$0xff]  }
  0xa9   :  { %2482 = vmatpush1.bf16.msra.mxu0 %v3925_v18  ;;  %2728 = vmatpush1.bf16.msra.mxu1 %v3928_v19  ;;  %v4017_v18 = vld [vmem:[#allocation5 + $0x444] ss:$16 sps:$4 sm:$0xff]   ;;  %v4020_v19 = vld [vmem:[#allocation5 + $0x44c] ss:$16 sps:$4 sm:$0xff]  }
  0xaa   :  { %2483 = vmatprep.subr.bf16.mxu0 %v3933_v20  ;;  %2729 = vmatprep.subr.bf16.mxu1 %v3936_v21  ;;  %v4015_v20 = vld [vmem:[#allocation5 + $0x440] ss:$16 sps:$4 sm:$0xff]   ;;  %v4018_v21 = vld [vmem:[#allocation5 + $0x448] ss:$16 sps:$4 sm:$0xff]  }
  0xad   :  { %2484 = vmatpush1.bf16.msra.mxu0 %v3931_v22  ;;  %2730 = vmatpush1.bf16.msra.mxu1 %v3934_v23  ;;  %v4023_v22 = vld [vmem:[#allocation5 + $0x464] ss:$16 sps:$4 sm:$0xff]   ;;  %v4026_v23 = vld [vmem:[#allocation5 + $0x46c] ss:$16 sps:$4 sm:$0xff]  }
  0xae   :  { %2485 = vmatprep.subr.bf16.mxu0 %v3939_v24  ;;  %2731 = vmatprep.subr.bf16.mxu1 %v3942_v25  ;;  %v4021_v24 = vld [vmem:[#allocation5 + $0x460] ss:$16 sps:$4 sm:$0xff]   ;;  %v4024_v25 = vld [vmem:[#allocation5 + $0x468] ss:$16 sps:$4 sm:$0xff]  }
  0xb1   :  { %2486 = vmatpush1.bf16.msra.mxu0 %v3937_v26  ;;  %2732 = vmatpush1.bf16.msra.mxu1 %v3940_v27  ;;  %v4029_v26 = vld [vmem:[#allocation5 + $0x484] ss:$16 sps:$4 sm:$0xff]   ;;  %v4032_v27 = vld [vmem:[#allocation5 + $0x48c] ss:$16 sps:$4 sm:$0xff]  }
  0xb2   :  { %2487 = vmatprep.subr.bf16.mxu0 %v3945_v28  ;;  %2733 = vmatprep.subr.bf16.mxu1 %v3948_v29  ;;  %v4027_v28 = vld [vmem:[#allocation5 + $0x480] ss:$16 sps:$4 sm:$0xff]   ;;  %v4030_v29 = vld [vmem:[#allocation5 + $0x488] ss:$16 sps:$4 sm:$0xff]  }
  0xb5   :  { %2488 = vmatpush1.bf16.msra.mxu0 %v3943_v31  ;;  %2734 = vmatpush1.bf16.msra.mxu1 %v3946_v33  ;;  %v4038_v31 = vld [vmem:[#allocation5 + $0x4ac] ss:$16 sps:$4 sm:$0xff]   ;;  %v4036_v33 = vld [vmem:[#allocation5 + $0x4a8] ss:$16 sps:$4 sm:$0xff]  }
  0xb6   :  { %2489 = vmatprep.subr.bf16.mxu0 %v3951_v34  ;;  %2735 = vmatprep.subr.bf16.mxu1 %v3954_v35  ;;  %v4041_v34 = vld [vmem:[#allocation5 + $0x4c4] ss:$16 sps:$4 sm:$0xff]   ;;  %v4044_v35 = vld [vmem:[#allocation5 + $0x4cc] ss:$16 sps:$4 sm:$0xff]  }
  0xb9   :  { %2490 = vmatpush1.bf16.msra.mxu0 %v3949_v36  ;;  %2736 = vmatpush1.bf16.msra.mxu1 %v3952_v37  ;;  %v4039_v36 = vld [vmem:[#allocation5 + $0x4c0] ss:$16 sps:$4 sm:$0xff]   ;;  %v4042_v37 = vld [vmem:[#allocation5 + $0x4c8] ss:$16 sps:$4 sm:$0xff]  }
  0xba   :  { %2491 = vmatprep.subr.bf16.mxu0 %v3957_v38  ;;  %2737 = vmatprep.subr.bf16.mxu1 %v3960_v39  ;;  %v4047_v38 = vld [vmem:[#allocation5 + $0x4e4] ss:$16 sps:$4 sm:$0xff]   ;;  %v4050_v39 = vld [vmem:[#allocation5 + $0x4ec] ss:$16 sps:$4 sm:$0xff]  }
  0xbd   :  { %2492 = vmatpush1.bf16.msra.mxu0 %v3955_v40  ;;  %2738 = vmatpush1.bf16.msra.mxu1 %v3958_v41  ;;  %v4045_v40 = vld [vmem:[#allocation5 + $0x4e0] ss:$16 sps:$4 sm:$0xff]   ;;  %v4048_v41 = vld [vmem:[#allocation5 + $0x4e8] ss:$16 sps:$4 sm:$0xff]  }
  0xbe   :  { %2493 = vmatprep.subr.bf16.mxu0 %v3963_v42  ;;  %2739 = vmatprep.subr.bf16.mxu1 %v3966_v43  ;;  %v4053_v42 = vld [vmem:[#allocation5 + $0x504] ss:$16 sps:$4 sm:$0xff]   ;;  %v4056_v43 = vld [vmem:[#allocation5 + $0x50c] ss:$16 sps:$4 sm:$0xff]  }
  0xc1   :  { %2494 = vmatpush1.bf16.msra.mxu0 %v3961_v44  ;;  %2740 = vmatpush1.bf16.msra.mxu1 %v3964_v45  ;;  %v4051_v44 = vld [vmem:[#allocation5 + $0x500] ss:$16 sps:$4 sm:$0xff]   ;;  %v4054_v45 = vld [vmem:[#allocation5 + $0x508] ss:$16 sps:$4 sm:$0xff]  }
  0xc2   :  { %2495 = vmatprep.subr.bf16.mxu0 %v3969_v46  ;;  %2741 = vmatprep.subr.bf16.mxu1 %v3972_v47  ;;  %v4059_v46 = vld [vmem:[#allocation5 + $0x524] ss:$16 sps:$4 sm:$0xff]   ;;  %v4062_v47 = vld [vmem:[#allocation5 + $0x52c] ss:$16 sps:$4 sm:$0xff]  }
  0xc5   :  { %2496 = vmatpush1.bf16.msra.mxu0 %v3967_v48  ;;  %2742 = vmatpush1.bf16.msra.mxu1 %v3970_v49  ;;  %v4057_v48 = vld [vmem:[#allocation5 + $0x520] ss:$16 sps:$4 sm:$0xff]   ;;  %v4060_v49 = vld [vmem:[#allocation5 + $0x528] ss:$16 sps:$4 sm:$0xff]  }
  0xc6   :  { %2497 = vmatprep.subr.bf16.mxu0 %v3975_v50  ;;  %2743 = vmatprep.subr.bf16.mxu1 %v3978_v51  ;;  %v4065_v50 = vld [vmem:[#allocation5 + $0x544] ss:$16 sps:$4 sm:$0xff]   ;;  %v4068_v51 = vld [vmem:[#allocation5 + $0x54c] ss:$16 sps:$4 sm:$0xff]  }
  0xc9   :  { %2498 = vmatpush1.bf16.msra.mxu0 %v3973_v52  ;;  %2744 = vmatpush1.bf16.msra.mxu1 %v3976_v53  ;;  %v4063_v52 = vld [vmem:[#allocation5 + $0x540] ss:$16 sps:$4 sm:$0xff]   ;;  %v4066_v53 = vld [vmem:[#allocation5 + $0x548] ss:$16 sps:$4 sm:$0xff]  }
  0xca   :  { %2499 = vmatprep.subr.bf16.mxu0 %v3981_v54  ;;  %2745 = vmatprep.subr.bf16.mxu1 %v3984_v55  ;;  %v4071_v54 = vld [vmem:[#allocation5 + $0x564] ss:$16 sps:$4 sm:$0xff]   ;;  %v4074_v55 = vld [vmem:[#allocation5 + $0x56c] ss:$16 sps:$4 sm:$0xff]  }
  0xcd   :  { %2500 = vmatpush1.bf16.msra.mxu0 %v3979_v56  ;;  %2746 = vmatpush1.bf16.msra.mxu1 %v3982_v57  ;;  %v4069_v56 = vld [vmem:[#allocation5 + $0x560] ss:$16 sps:$4 sm:$0xff]   ;;  %v4072_v57 = vld [vmem:[#allocation5 + $0x568] ss:$16 sps:$4 sm:$0xff]  }
  0xce   :  { %2501 = vmatprep.subr.bf16.mxu0 %v3987_v58  ;;  %2747 = vmatprep.subr.bf16.mxu1 %v3990_v59  ;;  %v4077_v58 = vld [vmem:[#allocation5 + $0x584] ss:$16 sps:$4 sm:$0xff]   ;;  %v4080_v59 = vld [vmem:[#allocation5 + $0x58c] ss:$16 sps:$4 sm:$0xff]  }
  0xd1   :  { %2502 = vmatpush1.bf16.msra.mxu0 %v3985_v60  ;;  %2748 = vmatpush1.bf16.msra.mxu1 %v3988_v61  ;;  %v4075_v60 = vld [vmem:[#allocation5 + $0x580] ss:$16 sps:$4 sm:$0xff]   ;;  %v4078_v61 = vld [vmem:[#allocation5 + $0x588] ss:$16 sps:$4 sm:$0xff]  }
  0xd2   :  { %2503 = vmatprep.subr.bf16.mxu0 %v3993_v62  ;;  %2749 = vmatprep.subr.bf16.mxu1 %v3996_v63  ;;  %v4083_v62 = vld [vmem:[#allocation5 + $0x5a4] ss:$16 sps:$4 sm:$0xff]   ;;  %v4086_v63 = vld [vmem:[#allocation5 + $0x5ac] ss:$16 sps:$4 sm:$0xff]  }
  0xd5   :  { %2504 = vmatpush1.bf16.msra.mxu0 %v3991_v0  ;;  %2750 = vmatpush1.bf16.msra.mxu1 %v3994_v1  ;;  %v4081_v0 = vld [vmem:[#allocation5 + $0x5a0] ss:$16 sps:$4 sm:$0xff]   ;;  %v4084_v1 = vld [vmem:[#allocation5 + $0x5a8] ss:$16 sps:$4 sm:$0xff]  }
  0xd6   :  { %2505 = vmatprep.subr.bf16.mxu0 %v3999_v2  ;;  %2751 = vmatprep.subr.bf16.mxu1 %v4002_v3  ;;  %v4089_v2 = vld [vmem:[#allocation5 + $0x5c4] ss:$16 sps:$4 sm:$0xff]   ;;  %v4092_v3 = vld [vmem:[#allocation5 + $0x5cc] ss:$16 sps:$4 sm:$0xff]  }
  0xd9   :  { %2506 = vmatpush1.bf16.msra.mxu0 %v3997_v4  ;;  %2752 = vmatpush1.bf16.msra.mxu1 %v4000_v5  ;;  %v4087_v4 = vld [vmem:[#allocation5 + $0x5c0] ss:$16 sps:$4 sm:$0xff]   ;;  %v4090_v5 = vld [vmem:[#allocation5 + $0x5c8] ss:$16 sps:$4 sm:$0xff]  }
  0xda   :  { %2516 = vmatprep.subr.bf16.mxu0 %v4005_v6  ;;  %2762 = vmatprep.subr.bf16.mxu1 %v4008_v8  ;;  %v4095_v6 = vld [vmem:[#allocation5 + $0x5e4] ss:$16 sps:$4 sm:$0xff]   ;;  %v4093_v8 = vld [vmem:[#allocation5 + $0x5e0] ss:$16 sps:$4 sm:$0xff]  }
  0xdc   :  { %2508 = vmatmul.mubr.bf16.vlgmr.msra.gmra.mrb[0].mxu0 %v98_v11  ;;  %2754 = vmatmul.mubr.bf16.vlgmr.msra.gmra.mrb[0].mxu1 %v98_v11  ;;  %v88_v11 = vld [vmem:[#allocation2 + $0x20] sm:$0xff] }
  0xdd   :  { %2517 = vmatpush1.bf16.msra.mxu0 %v4003_v9  ;;  %2763 = vmatpush1.bf16.msra.mxu1 %v4006_v10  ;;  %v4096_v9 = vld [vmem:[#allocation5 + $0x5e8] ss:$16 sps:$4 sm:$0xff]   ;;  %v4101_v10 = vld [vmem:[#allocation5 + $0x604] ss:$16 sps:$4 sm:$0xff]  }
  0xde   :  { %2518 = vmatprep.subr.bf16.mxu0 %v4011_v12  ;;  %2764 = vmatprep.subr.bf16.mxu1 %v4014_v13  ;;  %v4104_v12 = vld [vmem:[#allocation5 + $0x60c] ss:$16 sps:$4 sm:$0xff]   ;;  %v4099_v13 = vld [vmem:[#allocation5 + $0x600] ss:$16 sps:$4 sm:$0xff]  }
  0xdf   :  { %2548 = vmatprep.mubr.bf16.mxu0 %v101_v15  ;;  %2794 = vmatprep.mubr.bf16.mxu1 %v101_v15  ;;  %v100_v15 = vpack.c.bf16 %v88_v11, %v88_v11  ;;  %v4194_v11 = vld [vmem:[#allocation5 + $0x7ec] ss:$16 sps:$4 sm:$0xff]  }
  0xe1   :  { %2519 = vmatpush1.bf16.msra.mxu0 %v4009_v16  ;;  %2765 = vmatpush1.bf16.msra.mxu1 %v4012_v17  ;;  %v91_v16 = vld [vmem:[#allocation2 + $0x38] sm:$0xff]  ;;  %v4107_v17 = vld [vmem:[#allocation5 + $0x624] ss:$16 sps:$4 sm:$0xff]  }
  0xe2   :  { %2520 = vmatprep.subr.bf16.mxu0 %v4017_v18  ;;  %2766 = vmatprep.subr.bf16.mxu1 %v4020_v19  ;;  %v4110_v18 = vld [vmem:[#allocation5 + $0x62c] ss:$16 sps:$4 sm:$0xff]   ;;  %v103_v19 = vpack.c.bf16 %v91_v16, %v91_v16 }
  0xe3   :  { %v4200_v16 = vld [vmem:[#allocation5 + $0x80c] ss:$16 sps:$4 sm:$0xff]  }
  0xe5   :  { %2521 = vmatpush1.bf16.msra.mxu0 %v4015_v20  ;;  %2767 = vmatpush1.bf16.msra.mxu1 %v4018_v21  ;;  %v4105_v20 = vld [vmem:[#allocation5 + $0x620] ss:$16 sps:$4 sm:$0xff]   ;;  %v4108_v21 = vld [vmem:[#allocation5 + $0x628] ss:$16 sps:$4 sm:$0xff]  }
  0xe6   :  { %2522 = vmatprep.subr.bf16.mxu0 %v4023_v22  ;;  %2768 = vmatprep.subr.bf16.mxu1 %v4026_v23  ;;  %v4113_v22 = vld [vmem:[#allocation5 + $0x644] ss:$16 sps:$4 sm:$0xff]   ;;  %v4116_v23 = vld [vmem:[#allocation5 + $0x64c] ss:$16 sps:$4 sm:$0xff]  }
  0xe9   :  { %2523 = vmatpush1.bf16.msra.mxu0 %v4021_v24  ;;  %2769 = vmatpush1.bf16.msra.mxu1 %v4024_v25  ;;  %v4111_v24 = vld [vmem:[#allocation5 + $0x640] ss:$16 sps:$4 sm:$0xff]   ;;  %v4114_v25 = vld [vmem:[#allocation5 + $0x648] ss:$16 sps:$4 sm:$0xff]  }
  0xea   :  { %2524 = vmatprep.subr.bf16.mxu0 %v4029_v26  ;;  %2770 = vmatprep.subr.bf16.mxu1 %v4032_v27  ;;  %v4119_v26 = vld [vmem:[#allocation5 + $0x664] ss:$16 sps:$4 sm:$0xff]   ;;  %v4122_v27 = vld [vmem:[#allocation5 + $0x66c] ss:$16 sps:$4 sm:$0xff]  }
  0xed   :  { %2525 = vmatpush1.bf16.msra.mxu0 %v4027_v28  ;;  %2771 = vmatpush1.bf16.msra.mxu1 %v4030_v29  ;;  %v4117_v28 = vld [vmem:[#allocation5 + $0x660] ss:$16 sps:$4 sm:$0xff]   ;;  %v4120_v29 = vld [vmem:[#allocation5 + $0x668] ss:$16 sps:$4 sm:$0xff]  }
  0xee   :  { %2526 = vmatprep.subr.bf16.mxu0 %v4035_v30  ;;  %2772 = vmatprep.subr.bf16.mxu1 %v4038_v31  ;;  %v4125_v30 = vld [vmem:[#allocation5 + $0x684] ss:$16 sps:$4 sm:$0xff]   ;;  %v4128_v31 = vld [vmem:[#allocation5 + $0x68c] ss:$16 sps:$4 sm:$0xff]  }
  0xf1   :  { %2527 = vmatpush1.bf16.msra.mxu0 %v4033_v32  ;;  %2773 = vmatpush1.bf16.msra.mxu1 %v4036_v33  ;;  %v4123_v32 = vld [vmem:[#allocation5 + $0x680] ss:$16 sps:$4 sm:$0xff]   ;;  %v4126_v33 = vld [vmem:[#allocation5 + $0x688] ss:$16 sps:$4 sm:$0xff]  }
  0xf2   :  { %2528 = vmatprep.subr.bf16.mxu0 %v4041_v34  ;;  %2774 = vmatprep.subr.bf16.mxu1 %v4044_v35  ;;  %v4131_v34 = vld [vmem:[#allocation5 + $0x6a4] ss:$16 sps:$4 sm:$0xff]   ;;  %v4134_v35 = vld [vmem:[#allocation5 + $0x6ac] ss:$16 sps:$4 sm:$0xff]  }
  0xf5   :  { %2529 = vmatpush1.bf16.msra.mxu0 %v4039_v36  ;;  %2775 = vmatpush1.bf16.msra.mxu1 %v4042_v37  ;;  %v4129_v36 = vld [vmem:[#allocation5 + $0x6a0] ss:$16 sps:$4 sm:$0xff]   ;;  %v4132_v37 = vld [vmem:[#allocation5 + $0x6a8] ss:$16 sps:$4 sm:$0xff]  }
  0xf6   :  { %2530 = vmatprep.subr.bf16.mxu0 %v4047_v38  ;;  %2776 = vmatprep.subr.bf16.mxu1 %v4050_v39  ;;  %v4137_v38 = vld [vmem:[#allocation5 + $0x6c4] ss:$16 sps:$4 sm:$0xff]   ;;  %v4140_v39 = vld [vmem:[#allocation5 + $0x6cc] ss:$16 sps:$4 sm:$0xff]  }
  0xf9   :  { %2531 = vmatpush1.bf16.msra.mxu0 %v4045_v40  ;;  %2777 = vmatpush1.bf16.msra.mxu1 %v4048_v41  ;;  %v4135_v40 = vld [vmem:[#allocation5 + $0x6c0] ss:$16 sps:$4 sm:$0xff]   ;;  %v4138_v41 = vld [vmem:[#allocation5 + $0x6c8] ss:$16 sps:$4 sm:$0xff]  }
  0xfa   :  { %2532 = vmatprep.subr.bf16.mxu0 %v4053_v42  ;;  %2778 = vmatprep.subr.bf16.mxu1 %v4056_v43  ;;  %v4143_v42 = vld [vmem:[#allocation5 + $0x6e4] ss:$16 sps:$4 sm:$0xff]   ;;  %v4146_v43 = vld [vmem:[#allocation5 + $0x6ec] ss:$16 sps:$4 sm:$0xff]  }
  0xfd   :  { %2533 = vmatpush1.bf16.msra.mxu0 %v4051_v44  ;;  %2779 = vmatpush1.bf16.msra.mxu1 %v4054_v45  ;;  %v4141_v44 = vld [vmem:[#allocation5 + $0x6e0] ss:$16 sps:$4 sm:$0xff]   ;;  %v4144_v45 = vld [vmem:[#allocation5 + $0x6e8] ss:$16 sps:$4 sm:$0xff]  }
  0xfe   :  { %2534 = vmatprep.subr.bf16.mxu0 %v4059_v46  ;;  %2780 = vmatprep.subr.bf16.mxu1 %v4062_v47  ;;  %v4149_v46 = vld [vmem:[#allocation5 + $0x704] ss:$16 sps:$4 sm:$0xff]   ;;  %v4152_v47 = vld [vmem:[#allocation5 + $0x70c] ss:$16 sps:$4 sm:$0xff]  }
 0x101   :  { %2535 = vmatpush1.bf16.msra.mxu0 %v4057_v48  ;;  %2781 = vmatpush1.bf16.msra.mxu1 %v4060_v49  ;;  %v4147_v48 = vld [vmem:[#allocation5 + $0x700] ss:$16 sps:$4 sm:$0xff]   ;;  %v4150_v49 = vld [vmem:[#allocation5 + $0x708] ss:$16 sps:$4 sm:$0xff]  }
 0x102   :  { %2536 = vmatprep.subr.bf16.mxu0 %v4065_v50  ;;  %2782 = vmatprep.subr.bf16.mxu1 %v4068_v51  ;;  %v4155_v50 = vld [vmem:[#allocation5 + $0x724] ss:$16 sps:$4 sm:$0xff]   ;;  %v4158_v51 = vld [vmem:[#allocation5 + $0x72c] ss:$16 sps:$4 sm:$0xff]  }
 0x105   :  { %2537 = vmatpush1.bf16.msra.mxu0 %v4063_v52  ;;  %2783 = vmatpush1.bf16.msra.mxu1 %v4066_v53  ;;  %v4153_v52 = vld [vmem:[#allocation5 + $0x720] ss:$16 sps:$4 sm:$0xff]   ;;  %v4156_v53 = vld [vmem:[#allocation5 + $0x728] ss:$16 sps:$4 sm:$0xff]  }
 0x106   :  { %2538 = vmatprep.subr.bf16.mxu0 %v4071_v54  ;;  %2784 = vmatprep.subr.bf16.mxu1 %v4074_v55  ;;  %v4161_v54 = vld [vmem:[#allocation5 + $0x744] ss:$16 sps:$4 sm:$0xff]   ;;  %v4164_v55 = vld [vmem:[#allocation5 + $0x74c] ss:$16 sps:$4 sm:$0xff]  }
 0x109   :  { %2539 = vmatpush1.bf16.msra.mxu0 %v4069_v56  ;;  %2785 = vmatpush1.bf16.msra.mxu1 %v4072_v57  ;;  %v4159_v56 = vld [vmem:[#allocation5 + $0x740] ss:$16 sps:$4 sm:$0xff]   ;;  %v4162_v57 = vld [vmem:[#allocation5 + $0x748] ss:$16 sps:$4 sm:$0xff]  }
 0x10a   :  { %2540 = vmatprep.subr.bf16.mxu0 %v4077_v58  ;;  %2786 = vmatprep.subr.bf16.mxu1 %v4080_v59  ;;  %v4167_v58 = vld [vmem:[#allocation5 + $0x764] ss:$16 sps:$4 sm:$0xff]   ;;  %v4170_v59 = vld [vmem:[#allocation5 + $0x76c] ss:$16 sps:$4 sm:$0xff]  }
 0x10d   :  { %2541 = vmatpush1.bf16.msra.mxu0 %v4075_v60  ;;  %2787 = vmatpush1.bf16.msra.mxu1 %v4078_v61  ;;  %v4165_v60 = vld [vmem:[#allocation5 + $0x760] ss:$16 sps:$4 sm:$0xff]   ;;  %v4168_v61 = vld [vmem:[#allocation5 + $0x768] ss:$16 sps:$4 sm:$0xff]  }
 0x10e   :  { %2542 = vmatprep.subr.bf16.mxu0 %v4083_v62  ;;  %2788 = vmatprep.subr.bf16.mxu1 %v4086_v63  ;;  %v4173_v62 = vld [vmem:[#allocation5 + $0x784] ss:$16 sps:$4 sm:$0xff]   ;;  %v4176_v63 = vld [vmem:[#allocation5 + $0x78c] ss:$16 sps:$4 sm:$0xff]  }
 0x111   :  { %2543 = vmatpush1.bf16.msra.mxu0 %v4081_v0  ;;  %2789 = vmatpush1.bf16.msra.mxu1 %v4084_v1  ;;  %v4171_v0 = vld [vmem:[#allocation5 + $0x780] ss:$16 sps:$4 sm:$0xff]   ;;  %v4174_v1 = vld [vmem:[#allocation5 + $0x788] ss:$16 sps:$4 sm:$0xff]  }
 0x112   :  { %2544 = vmatprep.subr.bf16.mxu0 %v4089_v2  ;;  %2790 = vmatprep.subr.bf16.mxu1 %v4092_v3  ;;  %v4179_v2 = vld [vmem:[#allocation5 + $0x7a4] ss:$16 sps:$4 sm:$0xff]   ;;  %v4182_v3 = vld [vmem:[#allocation5 + $0x7ac] ss:$16 sps:$4 sm:$0xff]  }
 0x115   :  { %2545 = vmatpush1.bf16.msra.mxu0 %v4087_v4  ;;  %2791 = vmatpush1.bf16.msra.mxu1 %v4090_v5  ;;  %v4177_v4 = vld [vmem:[#allocation5 + $0x7a0] ss:$16 sps:$4 sm:$0xff]   ;;  %v4180_v5 = vld [vmem:[#allocation5 + $0x7a8] ss:$16 sps:$4 sm:$0xff]  }
 0x116   :  { %2546 = vmatprep.subr.bf16.mxu0 %v4095_v6  ;;  %2792 = vmatprep.subr.bf16.mxu1 %v4098_v7  ;;  %v4185_v6 = vld [vmem:[#allocation5 + $0x7c4] ss:$16 sps:$4 sm:$0xff]   ;;  %v4188_v7 = vld [vmem:[#allocation5 + $0x7cc] ss:$16 sps:$4 sm:$0xff]  }
 0x119   :  { %2547 = vmatpush1.bf16.msra.mxu0 %v4093_v8  ;;  %2793 = vmatpush1.bf16.msra.mxu1 %v4096_v9  ;;  %v4183_v8 = vld [vmem:[#allocation5 + $0x7c0] ss:$16 sps:$4 sm:$0xff]   ;;  %v4186_v9 = vld [vmem:[#allocation5 + $0x7c8] ss:$16 sps:$4 sm:$0xff]  }
 0x11a   :  { %2557 = vmatprep.subr.bf16.mxu0 %v4101_v10  ;;  %2803 = vmatprep.subr.bf16.mxu1 %v4104_v12  ;;  %v4191_v10 = vld [vmem:[#allocation5 + $0x7e4] ss:$16 sps:$4 sm:$0xff]   ;;  %v4189_v12 = vld [vmem:[#allocation5 + $0x7e0] ss:$16 sps:$4 sm:$0xff]  }
 0x11c   :  { %2549 = vmatmul.mubr.bf16.vlgmr.msra.gmra.mrb[0].mxu0 %v100_v15  ;;  %2795 = vmatmul.mubr.bf16.vlgmr.msra.gmra.mrb[0].mxu1 %v100_v15  ;;  %v4197_v15 = vld [vmem:[#allocation5 + $0x804] ss:$16 sps:$4 sm:$0xff]  }
 0x11d   :  { %2558 = vmatpush1.bf16.msra.mxu0 %v4099_v13  ;;  %2804 = vmatpush1.bf16.msra.mxu1 %v4102_v14  ;;  %v4192_v13 = vld [vmem:[#allocation5 + $0x7e8] ss:$16 sps:$4 sm:$0xff]   ;;  %v90_v14 = vld [vmem:[#allocation2 + $0x30] sm:$0xff] }
 0x11e   :  { %2559 = vmatprep.subr.bf16.mxu0 %v4107_v17  ;;  %2805 = vmatprep.subr.bf16.mxu1 %v4110_v18  ;;  %v102_v17 = vpack.c.bf16 %v90_v14, %v90_v14  ;;  %v93_v18 = vld [vmem:[#allocation2 + $0x48] sm:$0xff]  ;;  %v4287_v14 = vld [vmem:[#allocation5 + $0x9e4] ss:$16 sps:$4 sm:$0xff]  }
 0x11f   :  { %2589 = vmatprep.mubr.bf16.mxu0 %v103_v19  ;;  %2835 = vmatprep.mubr.bf16.mxu1 %v103_v19  ;;  %v4195_v19 = vld [vmem:[#allocation5 + $0x800] ss:$16 sps:$4 sm:$0xff]  }
 0x121   :  { %2560 = vmatpush1.bf16.msra.mxu0 %v4105_v20  ;;  %2806 = vmatpush1.bf16.msra.mxu1 %v4108_v21  ;;  %v4198_v20 = vld [vmem:[#allocation5 + $0x808] ss:$16 sps:$4 sm:$0xff]   ;;  %v4203_v21 = vld [vmem:[#allocation5 + $0x824] ss:$16 sps:$4 sm:$0xff]  }
 0x122   :  { %2561 = vmatprep.subr.bf16.mxu0 %v4113_v22  ;;  %2807 = vmatprep.subr.bf16.mxu1 %v4116_v23  ;;  %v4206_v22 = vld [vmem:[#allocation5 + $0x82c] ss:$16 sps:$4 sm:$0xff]   ;;  %v105_v23 = vpack.c.bf16 %v93_v18, %v93_v18  ;;  %v92_v18 = vld [vmem:[#allocation2 + $0x40] sm:$0xff] }
 0x125   :  { %2562 = vmatpush1.bf16.msra.mxu0 %v4111_v24  ;;  %2808 = vmatpush1.bf16.msra.mxu1 %v4114_v25  ;;  %v4201_v24 = vld [vmem:[#allocation5 + $0x820] ss:$16 sps:$4 sm:$0xff]   ;;  %v4204_v25 = vld [vmem:[#allocation5 + $0x828] ss:$16 sps:$4 sm:$0xff]  }
 0x126   :  { %2563 = vmatprep.subr.bf16.mxu0 %v4119_v26  ;;  %2809 = vmatprep.subr.bf16.mxu1 %v4122_v27  ;;  %v4209_v26 = vld [vmem:[#allocation5 + $0x844] ss:$16 sps:$4 sm:$0xff]   ;;  %v4212_v27 = vld [vmem:[#allocation5 + $0x84c] ss:$16 sps:$4 sm:$0xff]  }
 0x129   :  { %2564 = vmatpush1.bf16.msra.mxu0 %v4117_v28  ;;  %2810 = vmatpush1.bf16.msra.mxu1 %v4120_v29  ;;  %v4207_v28 = vld [vmem:[#allocation5 + $0x840] ss:$16 sps:$4 sm:$0xff]   ;;  %v4210_v29 = vld [vmem:[#allocation5 + $0x848] ss:$16 sps:$4 sm:$0xff]  }
 0x12a   :  { %2565 = vmatprep.subr.bf16.mxu0 %v4125_v30  ;;  %2811 = vmatprep.subr.bf16.mxu1 %v4128_v31  ;;  %v4215_v30 = vld [vmem:[#allocation5 + $0x864] ss:$16 sps:$4 sm:$0xff]   ;;  %v4218_v31 = vld [vmem:[#allocation5 + $0x86c] ss:$16 sps:$4 sm:$0xff]  }
 0x12d   :  { %2566 = vmatpush1.bf16.msra.mxu0 %v4123_v32  ;;  %2812 = vmatpush1.bf16.msra.mxu1 %v4126_v33  ;;  %v4213_v32 = vld [vmem:[#allocation5 + $0x860] ss:$16 sps:$4 sm:$0xff]   ;;  %v4216_v33 = vld [vmem:[#allocation5 + $0x868] ss:$16 sps:$4 sm:$0xff]  }
 0x12e   :  { %2567 = vmatprep.subr.bf16.mxu0 %v4131_v34  ;;  %2813 = vmatprep.subr.bf16.mxu1 %v4134_v35  ;;  %v4221_v34 = vld [vmem:[#allocation5 + $0x884] ss:$16 sps:$4 sm:$0xff]   ;;  %v4224_v35 = vld [vmem:[#allocation5 + $0x88c] ss:$16 sps:$4 sm:$0xff]  }
 0x131   :  { %2568 = vmatpush1.bf16.msra.mxu0 %v4129_v36  ;;  %2814 = vmatpush1.bf16.msra.mxu1 %v4132_v37  ;;  %v4219_v36 = vld [vmem:[#allocation5 + $0x880] ss:$16 sps:$4 sm:$0xff]   ;;  %v4222_v37 = vld [vmem:[#allocation5 + $0x888] ss:$16 sps:$4 sm:$0xff]  }
 0x132   :  { %2569 = vmatprep.subr.bf16.mxu0 %v4137_v38  ;;  %2815 = vmatprep.subr.bf16.mxu1 %v4140_v39  ;;  %v4227_v38 = vld [vmem:[#allocation5 + $0x8a4] ss:$16 sps:$4 sm:$0xff]   ;;  %v4230_v39 = vld [vmem:[#allocation5 + $0x8ac] ss:$16 sps:$4 sm:$0xff]  }
 0x135   :  { %2570 = vmatpush1.bf16.msra.mxu0 %v4135_v40  ;;  %2816 = vmatpush1.bf16.msra.mxu1 %v4138_v41  ;;  %v4225_v40 = vld [vmem:[#allocation5 + $0x8a0] ss:$16 sps:$4 sm:$0xff]   ;;  %v4228_v41 = vld [vmem:[#allocation5 + $0x8a8] ss:$16 sps:$4 sm:$0xff]  }
 0x136   :  { %2571 = vmatprep.subr.bf16.mxu0 %v4143_v42  ;;  %2817 = vmatprep.subr.bf16.mxu1 %v4146_v43  ;;  %v4233_v42 = vld [vmem:[#allocation5 + $0x8c4] ss:$16 sps:$4 sm:$0xff]   ;;  %v4236_v43 = vld [vmem:[#allocation5 + $0x8cc] ss:$16 sps:$4 sm:$0xff]  }
 0x139   :  { %2572 = vmatpush1.bf16.msra.mxu0 %v4141_v44  ;;  %2818 = vmatpush1.bf16.msra.mxu1 %v4144_v45  ;;  %v4231_v44 = vld [vmem:[#allocation5 + $0x8c0] ss:$16 sps:$4 sm:$0xff]   ;;  %v4234_v45 = vld [vmem:[#allocation5 + $0x8c8] ss:$16 sps:$4 sm:$0xff]  }
 0x13a   :  { %2573 = vmatprep.subr.bf16.mxu0 %v4149_v46  ;;  %2819 = vmatprep.subr.bf16.mxu1 %v4152_v47  ;;  %v4239_v46 = vld [vmem:[#allocation5 + $0x8e4] ss:$16 sps:$4 sm:$0xff]   ;;  %v4242_v47 = vld [vmem:[#allocation5 + $0x8ec] ss:$16 sps:$4 sm:$0xff]  }
 0x13d   :  { %2574 = vmatpush1.bf16.msra.mxu0 %v4147_v48  ;;  %2820 = vmatpush1.bf16.msra.mxu1 %v4150_v49  ;;  %v4237_v48 = vld [vmem:[#allocation5 + $0x8e0] ss:$16 sps:$4 sm:$0xff]   ;;  %v4240_v49 = vld [vmem:[#allocation5 + $0x8e8] ss:$16 sps:$4 sm:$0xff]  }
 0x13e   :  { %2575 = vmatprep.subr.bf16.mxu0 %v4155_v50  ;;  %2821 = vmatprep.subr.bf16.mxu1 %v4158_v51  ;;  %v4245_v50 = vld [vmem:[#allocation5 + $0x904] ss:$16 sps:$4 sm:$0xff]   ;;  %v4248_v51 = vld [vmem:[#allocation5 + $0x90c] ss:$16 sps:$4 sm:$0xff]  }
 0x141   :  { %2576 = vmatpush1.bf16.msra.mxu0 %v4153_v52  ;;  %2822 = vmatpush1.bf16.msra.mxu1 %v4156_v53  ;;  %v4243_v52 = vld [vmem:[#allocation5 + $0x900] ss:$16 sps:$4 sm:$0xff]   ;;  %v4246_v53 = vld [vmem:[#allocation5 + $0x908] ss:$16 sps:$4 sm:$0xff]  }
 0x142   :  { %2577 = vmatprep.subr.bf16.mxu0 %v4161_v54  ;;  %2823 = vmatprep.subr.bf16.mxu1 %v4164_v55  ;;  %v4251_v54 = vld [vmem:[#allocation5 + $0x924] ss:$16 sps:$4 sm:$0xff]   ;;  %v4254_v55 = vld [vmem:[#allocation5 + $0x92c] ss:$16 sps:$4 sm:$0xff]  }
 0x145   :  { %2578 = vmatpush1.bf16.msra.mxu0 %v4159_v56  ;;  %2824 = vmatpush1.bf16.msra.mxu1 %v4162_v57  ;;  %v4249_v56 = vld [vmem:[#allocation5 + $0x920] ss:$16 sps:$4 sm:$0xff]   ;;  %v4252_v57 = vld [vmem:[#allocation5 + $0x928] ss:$16 sps:$4 sm:$0xff]  }
 0x146   :  { %2579 = vmatprep.subr.bf16.mxu0 %v4167_v58  ;;  %2825 = vmatprep.subr.bf16.mxu1 %v4170_v59  ;;  %v4257_v58 = vld [vmem:[#allocation5 + $0x944] ss:$16 sps:$4 sm:$0xff]   ;;  %v4260_v59 = vld [vmem:[#allocation5 + $0x94c] ss:$16 sps:$4 sm:$0xff]  }
 0x149   :  { %2580 = vmatpush1.bf16.msra.mxu0 %v4165_v60  ;;  %2826 = vmatpush1.bf16.msra.mxu1 %v4168_v61  ;;  %v4255_v60 = vld [vmem:[#allocation5 + $0x940] ss:$16 sps:$4 sm:$0xff]   ;;  %v4258_v61 = vld [vmem:[#allocation5 + $0x948] ss:$16 sps:$4 sm:$0xff]  }
 0x14a   :  { %2581 = vmatprep.subr.bf16.mxu0 %v4173_v62  ;;  %2827 = vmatprep.subr.bf16.mxu1 %v4176_v63  ;;  %v4263_v62 = vld [vmem:[#allocation5 + $0x964] ss:$16 sps:$4 sm:$0xff]   ;;  %v4266_v63 = vld [vmem:[#allocation5 + $0x96c] ss:$16 sps:$4 sm:$0xff]  }
 0x14d   :  { %2582 = vmatpush1.bf16.msra.mxu0 %v4171_v0  ;;  %2828 = vmatpush1.bf16.msra.mxu1 %v4174_v1  ;;  %v4261_v0 = vld [vmem:[#allocation5 + $0x960] ss:$16 sps:$4 sm:$0xff]   ;;  %v4264_v1 = vld [vmem:[#allocation5 + $0x968] ss:$16 sps:$4 sm:$0xff]  }
 0x14e   :  { %2583 = vmatprep.subr.bf16.mxu0 %v4179_v2  ;;  %2829 = vmatprep.subr.bf16.mxu1 %v4182_v3  ;;  %v4269_v2 = vld [vmem:[#allocation5 + $0x984] ss:$16 sps:$4 sm:$0xff]   ;;  %v4272_v3 = vld [vmem:[#allocation5 + $0x98c] ss:$16 sps:$4 sm:$0xff]  }
 0x151   :  { %2584 = vmatpush1.bf16.msra.mxu0 %v4177_v4  ;;  %2830 = vmatpush1.bf16.msra.mxu1 %v4180_v5  ;;  %v4267_v4 = vld [vmem:[#allocation5 + $0x980] ss:$16 sps:$4 sm:$0xff]   ;;  %v4270_v5 = vld [vmem:[#allocation5 + $0x988] ss:$16 sps:$4 sm:$0xff]  }
 0x152   :  { %2585 = vmatprep.subr.bf16.mxu0 %v4185_v6  ;;  %2831 = vmatprep.subr.bf16.mxu1 %v4188_v7  ;;  %v4275_v6 = vld [vmem:[#allocation5 + $0x9a4] ss:$16 sps:$4 sm:$0xff]   ;;  %v4278_v7 = vld [vmem:[#allocation5 + $0x9ac] ss:$16 sps:$4 sm:$0xff]  }
 0x155   :  { %2586 = vmatpush1.bf16.msra.mxu0 %v4183_v8  ;;  %2832 = vmatpush1.bf16.msra.mxu1 %v4186_v9  ;;  %v4273_v8 = vld [vmem:[#allocation5 + $0x9a0] ss:$16 sps:$4 sm:$0xff]   ;;  %v4276_v9 = vld [vmem:[#allocation5 + $0x9a8] ss:$16 sps:$4 sm:$0xff]  }
 0x156   :  { %2587 = vmatprep.subr.bf16.mxu0 %v4191_v10  ;;  %2833 = vmatprep.subr.bf16.mxu1 %v4194_v11  ;;  %v4281_v10 = vld [vmem:[#allocation5 + $0x9c4] ss:$16 sps:$4 sm:$0xff]   ;;  %v4284_v11 = vld [vmem:[#allocation5 + $0x9cc] ss:$16 sps:$4 sm:$0xff]  }
 0x159   :  { %2588 = vmatpush1.bf16.msra.mxu0 %v4189_v12  ;;  %2834 = vmatpush1.bf16.msra.mxu1 %v4192_v13  ;;  %v4279_v12 = vld [vmem:[#allocation5 + $0x9c0] ss:$16 sps:$4 sm:$0xff]   ;;  %v4282_v13 = vld [vmem:[#allocation5 + $0x9c8] ss:$16 sps:$4 sm:$0xff]  }
 0x15a   :  { %2598 = vmatprep.subr.bf16.mxu0 %v4197_v15  ;;  %2844 = vmatprep.subr.bf16.mxu1 %v4200_v16  ;;  %v4290_v15 = vld [vmem:[#allocation5 + $0x9ec] ss:$16 sps:$4 sm:$0xff]   ;;  %v4285_v16 = vld [vmem:[#allocation5 + $0x9e0] ss:$16 sps:$4 sm:$0xff]  }
 0x15c   :  { %2590 = vmatmul.mubr.bf16.vlgmr.msra.gmra.mrb[0].mxu0 %v102_v17  ;;  %2836 = vmatmul.mubr.bf16.vlgmr.msra.gmra.mrb[0].mxu1 %v102_v17  ;;  %v4288_v17 = vld [vmem:[#allocation5 + $0x9e8] ss:$16 sps:$4 sm:$0xff]  }
 0x15d   :  { %2599 = vmatpush1.bf16.msra.mxu0 %v4195_v19  ;;  %2845 = vmatpush1.bf16.msra.mxu1 %v4198_v20  ;;  %v4293_v19 = vld [vmem:[#allocation5 + $0xa04] ss:$16 sps:$4 sm:$0xff]   ;;  %v4296_v20 = vld [vmem:[#allocation5 + $0xa0c] ss:$16 sps:$4 sm:$0xff]  }
 0x15e   :  { %2600 = vmatprep.subr.bf16.mxu0 %v4203_v21  ;;  %2846 = vmatprep.subr.bf16.mxu1 %v4206_v22  ;;  %v104_v21 = vpack.c.bf16 %v92_v18, %v92_v18  ;;  %v95_v22 = vld [vmem:[#allocation2 + $0x58] sm:$0xff]  ;;  %v4383_v18 = vld [vmem:[#allocation5 + $0xbe4] ss:$16 sps:$4 sm:$0xff]  }
 0x15f   :  { %2630 = vmatprep.mubr.bf16.mxu0 %v105_v23  ;;  %2876 = vmatprep.mubr.bf16.mxu1 %v105_v23  ;;  %v4291_v23 = vld [vmem:[#allocation5 + $0xa00] ss:$16 sps:$4 sm:$0xff]  }
 0x161   :  { %2601 = vmatpush1.bf16.msra.mxu0 %v4201_v24  ;;  %2847 = vmatpush1.bf16.msra.mxu1 %v4204_v25  ;;  %v4294_v24 = vld [vmem:[#allocation5 + $0xa08] ss:$16 sps:$4 sm:$0xff]   ;;  %v4299_v25 = vld [vmem:[#allocation5 + $0xa24] ss:$16 sps:$4 sm:$0xff]  }
 0x162   :  { %2602 = vmatprep.subr.bf16.mxu0 %v4209_v26  ;;  %2848 = vmatprep.subr.bf16.mxu1 %v4212_v27  ;;  %v4302_v26 = vld [vmem:[#allocation5 + $0xa2c] ss:$16 sps:$4 sm:$0xff]   ;;  %v107_v27 = vpack.c.bf16 %v95_v22, %v95_v22  ;;  %v94_v22 = vld [vmem:[#allocation2 + $0x50] sm:$0xff] }
 0x165   :  { %2603 = vmatpush1.bf16.msra.mxu0 %v4207_v28  ;;  %2849 = vmatpush1.bf16.msra.mxu1 %v4210_v29  ;;  %v4297_v28 = vld [vmem:[#allocation5 + $0xa20] ss:$16 sps:$4 sm:$0xff]   ;;  %v4300_v29 = vld [vmem:[#allocation5 + $0xa28] ss:$16 sps:$4 sm:$0xff]  }
 0x166   :  { %2604 = vmatprep.subr.bf16.mxu0 %v4215_v30  ;;  %2850 = vmatprep.subr.bf16.mxu1 %v4218_v31  ;;  %v4305_v30 = vld [vmem:[#allocation5 + $0xa44] ss:$16 sps:$4 sm:$0xff]   ;;  %v4308_v31 = vld [vmem:[#allocation5 + $0xa4c] ss:$16 sps:$4 sm:$0xff]  }
 0x169   :  { %2605 = vmatpush1.bf16.msra.mxu0 %v4213_v32  ;;  %2851 = vmatpush1.bf16.msra.mxu1 %v4216_v33  ;;  %v4303_v32 = vld [vmem:[#allocation5 + $0xa40] ss:$16 sps:$4 sm:$0xff]   ;;  %v4306_v33 = vld [vmem:[#allocation5 + $0xa48] ss:$16 sps:$4 sm:$0xff]  }
 0x16a   :  { %2606 = vmatprep.subr.bf16.mxu0 %v4221_v34  ;;  %2852 = vmatprep.subr.bf16.mxu1 %v4224_v35  ;;  %v4311_v34 = vld [vmem:[#allocation5 + $0xa64] ss:$16 sps:$4 sm:$0xff]   ;;  %v4314_v35 = vld [vmem:[#allocation5 + $0xa6c] ss:$16 sps:$4 sm:$0xff]  }
 0x16d   :  { %2607 = vmatpush1.bf16.msra.mxu0 %v4219_v36  ;;  %2853 = vmatpush1.bf16.msra.mxu1 %v4222_v37  ;;  %v4309_v36 = vld [vmem:[#allocation5 + $0xa60] ss:$16 sps:$4 sm:$0xff]   ;;  %v4312_v37 = vld [vmem:[#allocation5 + $0xa68] ss:$16 sps:$4 sm:$0xff]  }
 0x16e   :  { %2608 = vmatprep.subr.bf16.mxu0 %v4227_v38  ;;  %2854 = vmatprep.subr.bf16.mxu1 %v4230_v39  ;;  %v4317_v38 = vld [vmem:[#allocation5 + $0xa84] ss:$16 sps:$4 sm:$0xff]   ;;  %v4320_v39 = vld [vmem:[#allocation5 + $0xa8c] ss:$16 sps:$4 sm:$0xff]  }
 0x171   :  { %2609 = vmatpush1.bf16.msra.mxu0 %v4225_v40  ;;  %2855 = vmatpush1.bf16.msra.mxu1 %v4228_v41  ;;  %v4315_v40 = vld [vmem:[#allocation5 + $0xa80] ss:$16 sps:$4 sm:$0xff]   ;;  %v4318_v41 = vld [vmem:[#allocation5 + $0xa88] ss:$16 sps:$4 sm:$0xff]  }
 0x172   :  { %2610 = vmatprep.subr.bf16.mxu0 %v4233_v42  ;;  %2856 = vmatprep.subr.bf16.mxu1 %v4236_v43  ;;  %v4323_v42 = vld [vmem:[#allocation5 + $0xaa4] ss:$16 sps:$4 sm:$0xff]   ;;  %v4326_v43 = vld [vmem:[#allocation5 + $0xaac] ss:$16 sps:$4 sm:$0xff]  }
 0x175   :  { %2611 = vmatpush1.bf16.msra.mxu0 %v4231_v44  ;;  %2857 = vmatpush1.bf16.msra.mxu1 %v4234_v45  ;;  %v4321_v44 = vld [vmem:[#allocation5 + $0xaa0] ss:$16 sps:$4 sm:$0xff]   ;;  %v4324_v45 = vld [vmem:[#allocation5 + $0xaa8] ss:$16 sps:$4 sm:$0xff]  }
 0x176   :  { %2612 = vmatprep.subr.bf16.mxu0 %v4239_v46  ;;  %2858 = vmatprep.subr.bf16.mxu1 %v4242_v47  ;;  %v4329_v46 = vld [vmem:[#allocation5 + $0xac4] ss:$16 sps:$4 sm:$0xff]   ;;  %v4332_v47 = vld [vmem:[#allocation5 + $0xacc] ss:$16 sps:$4 sm:$0xff]  }
 0x179   :  { %2613 = vmatpush1.bf16.msra.mxu0 %v4237_v48  ;;  %2859 = vmatpush1.bf16.msra.mxu1 %v4240_v49  ;;  %v4327_v48 = vld [vmem:[#allocation5 + $0xac0] ss:$16 sps:$4 sm:$0xff]   ;;  %v4330_v49 = vld [vmem:[#allocation5 + $0xac8] ss:$16 sps:$4 sm:$0xff]  }
 0x17a   :  { %2614 = vmatprep.subr.bf16.mxu0 %v4245_v50  ;;  %2860 = vmatprep.subr.bf16.mxu1 %v4248_v51  ;;  %v4335_v50 = vld [vmem:[#allocation5 + $0xae4] ss:$16 sps:$4 sm:$0xff]   ;;  %v4338_v51 = vld [vmem:[#allocation5 + $0xaec] ss:$16 sps:$4 sm:$0xff]  }
 0x17d   :  { %2615 = vmatpush1.bf16.msra.mxu0 %v4243_v52  ;;  %2861 = vmatpush1.bf16.msra.mxu1 %v4246_v53  ;;  %v4333_v52 = vld [vmem:[#allocation5 + $0xae0] ss:$16 sps:$4 sm:$0xff]   ;;  %v4336_v53 = vld [vmem:[#allocation5 + $0xae8] ss:$16 sps:$4 sm:$0xff]  }
 0x17e   :  { %2616 = vmatprep.subr.bf16.mxu0 %v4251_v54  ;;  %2862 = vmatprep.subr.bf16.mxu1 %v4254_v55  ;;  %v4341_v54 = vld [vmem:[#allocation5 + $0xb04] ss:$16 sps:$4 sm:$0xff]   ;;  %v4344_v55 = vld [vmem:[#allocation5 + $0xb0c] ss:$16 sps:$4 sm:$0xff]  }
 0x181   :  { %2617 = vmatpush1.bf16.msra.mxu0 %v4249_v56  ;;  %2863 = vmatpush1.bf16.msra.mxu1 %v4252_v57  ;;  %v4339_v56 = vld [vmem:[#allocation5 + $0xb00] ss:$16 sps:$4 sm:$0xff]   ;;  %v4342_v57 = vld [vmem:[#allocation5 + $0xb08] ss:$16 sps:$4 sm:$0xff]  }
 0x182   :  { %2618 = vmatprep.subr.bf16.mxu0 %v4257_v58  ;;  %2864 = vmatprep.subr.bf16.mxu1 %v4260_v59  ;;  %v4347_v58 = vld [vmem:[#allocation5 + $0xb24] ss:$16 sps:$4 sm:$0xff]   ;;  %v4350_v59 = vld [vmem:[#allocation5 + $0xb2c] ss:$16 sps:$4 sm:$0xff]  }
 0x185   :  { %2619 = vmatpush1.bf16.msra.mxu0 %v4255_v60  ;;  %2865 = vmatpush1.bf16.msra.mxu1 %v4258_v61  ;;  %v4345_v60 = vld [vmem:[#allocation5 + $0xb20] ss:$16 sps:$4 sm:$0xff]   ;;  %v4348_v61 = vld [vmem:[#allocation5 + $0xb28] ss:$16 sps:$4 sm:$0xff]  }
 0x186   :  { %2620 = vmatprep.subr.bf16.mxu0 %v4263_v62  ;;  %2866 = vmatprep.subr.bf16.mxu1 %v4266_v63  ;;  %v4353_v62 = vld [vmem:[#allocation5 + $0xb44] ss:$16 sps:$4 sm:$0xff]   ;;  %v4356_v63 = vld [vmem:[#allocation5 + $0xb4c] ss:$16 sps:$4 sm:$0xff]  }
 0x189   :  { %2621 = vmatpush1.bf16.msra.mxu0 %v4261_v0  ;;  %2867 = vmatpush1.bf16.msra.mxu1 %v4264_v1  ;;  %v4351_v0 = vld [vmem:[#allocation5 + $0xb40] ss:$16 sps:$4 sm:$0xff]   ;;  %v4354_v1 = vld [vmem:[#allocation5 + $0xb48] ss:$16 sps:$4 sm:$0xff]  }
 0x18a   :  { %2622 = vmatprep.subr.bf16.mxu0 %v4269_v2  ;;  %2868 = vmatprep.subr.bf16.mxu1 %v4272_v3  ;;  %v4359_v2 = vld [vmem:[#allocation5 + $0xb64] ss:$16 sps:$4 sm:$0xff]   ;;  %v4362_v3 = vld [vmem:[#allocation5 + $0xb6c] ss:$16 sps:$4 sm:$0xff]  }
 0x18d   :  { %2623 = vmatpush1.bf16.msra.mxu0 %v4267_v4  ;;  %2869 = vmatpush1.bf16.msra.mxu1 %v4270_v5  ;;  %v4357_v4 = vld [vmem:[#allocation5 + $0xb60] ss:$16 sps:$4 sm:$0xff]   ;;  %v4360_v5 = vld [vmem:[#allocation5 + $0xb68] ss:$16 sps:$4 sm:$0xff]  }
 0x18e   :  { %2624 = vmatprep.subr.bf16.mxu0 %v4275_v6  ;;  %2870 = vmatprep.subr.bf16.mxu1 %v4278_v7  ;;  %v4365_v6 = vld [vmem:[#allocation5 + $0xb84] ss:$16 sps:$4 sm:$0xff]   ;;  %v4368_v7 = vld [vmem:[#allocation5 + $0xb8c] ss:$16 sps:$4 sm:$0xff]  }
 0x191   :  { %2625 = vmatpush1.bf16.msra.mxu0 %v4273_v8  ;;  %2871 = vmatpush1.bf16.msra.mxu1 %v4276_v9  ;;  %v4363_v8 = vld [vmem:[#allocation5 + $0xb80] ss:$16 sps:$4 sm:$0xff]   ;;  %v4366_v9 = vld [vmem:[#allocation5 + $0xb88] ss:$16 sps:$4 sm:$0xff]  }
 0x192   :  { %2626 = vmatprep.subr.bf16.mxu0 %v4281_v10  ;;  %2872 = vmatprep.subr.bf16.mxu1 %v4284_v11  ;;  %v4371_v10 = vld [vmem:[#allocation5 + $0xba4] ss:$16 sps:$4 sm:$0xff]   ;;  %v4374_v11 = vld [vmem:[#allocation5 + $0xbac] ss:$16 sps:$4 sm:$0xff]  }
 0x195   :  { %2627 = vmatpush1.bf16.msra.mxu0 %v4279_v12  ;;  %2873 = vmatpush1.bf16.msra.mxu1 %v4282_v13  ;;  %v4369_v12 = vld [vmem:[#allocation5 + $0xba0] ss:$16 sps:$4 sm:$0xff]   ;;  %v4372_v13 = vld [vmem:[#allocation5 + $0xba8] ss:$16 sps:$4 sm:$0xff]  }
 0x196   :  { %2628 = vmatprep.subr.bf16.mxu0 %v4287_v14  ;;  %2874 = vmatprep.subr.bf16.mxu1 %v4290_v15  ;;  %v4377_v14 = vld [vmem:[#allocation5 + $0xbc4] ss:$16 sps:$4 sm:$0xff]   ;;  %v4380_v15 = vld [vmem:[#allocation5 + $0xbcc] ss:$16 sps:$4 sm:$0xff]  }
 0x199   :  { %2629 = vmatpush1.bf16.msra.mxu0 %v4285_v16  ;;  %2875 = vmatpush1.bf16.msra.mxu1 %v4288_v17  ;;  %v4375_v16 = vld [vmem:[#allocation5 + $0xbc0] ss:$16 sps:$4 sm:$0xff]   ;;  %v4378_v17 = vld [vmem:[#allocation5 + $0xbc8] ss:$16 sps:$4 sm:$0xff]  }
 0x19a   :  { %2639 = vmatprep.subr.bf16.mxu0 %v4293_v19  ;;  %2885 = vmatprep.subr.bf16.mxu1 %v4296_v20  ;;  %v4386_v19 = vld [vmem:[#allocation5 + $0xbec] ss:$16 sps:$4 sm:$0xff]   ;;  %v4381_v20 = vld [vmem:[#allocation5 + $0xbe0] ss:$16 sps:$4 sm:$0xff]  }
 0x19c   :  { %2631 = vmatmul.mubr.bf16.vlgmr.msra.gmra.mrb[0].mxu0 %v104_v21  ;;  %2877 = vmatmul.mubr.bf16.vlgmr.msra.gmra.mrb[0].mxu1 %v104_v21  ;;  %v4384_v21 = vld [vmem:[#allocation5 + $0xbe8] ss:$16 sps:$4 sm:$0xff]  }
 0x19d   :  { %2640 = vmatpush1.bf16.msra.mxu0 %v4291_v23  ;;  %2886 = vmatpush1.bf16.msra.mxu1 %v4294_v24  ;;  %v4387_v23 = vld [vmem:[#allocation8 + $0x40] sm:$0xff]  }
 0x19e   :  { %2641 = vmatprep.subr.bf16.mxu0 %v4299_v25  ;;  %2887 = vmatprep.subr.bf16.mxu1 %v4302_v26  ;;  %v4388_v24 = vld [vmem:[#allocation8 + $0xc0] sm:$0xff]   ;;  %v106_v25 = vpack.c.bf16 %v94_v22, %v94_v22 }
 0x19f   :  { %2671 = vmatprep.mubr.bf16.mxu0 %v107_v27  ;;  %2917 = vmatprep.mubr.bf16.mxu1 %v107_v27  ;;  %v4389_v26 = vld [vmem:[#allocation8] sm:$0xff]  }
 0x1a0   :  { %v4390_v27 = vld [vmem:[#allocation8 + $0x80] sm:$0xff]  }
 0x1a1   :  { %2642 = vmatpush1.bf16.msra.mxu0 %v4297_v28  ;;  %2888 = vmatpush1.bf16.msra.mxu1 %v4300_v29  ;;  %v4391_v28 = vld [vmem:[#allocation8 + $0x48] sm:$0xff]  }
 0x1a2   :  { %2643 = vmatprep.subr.bf16.mxu0 %v4305_v30  ;;  %2889 = vmatprep.subr.bf16.mxu1 %v4308_v31  ;;  %v4392_v29 = vld [vmem:[#allocation8 + $0xc8] sm:$0xff]  }
 0x1a3   :  { %v4393_v30 = vld [vmem:[#allocation8 + $0x8] sm:$0xff]  }
 0x1a4   :  { %v4394_v31 = vld [vmem:[#allocation8 + $0x88] sm:$0xff]  }
 0x1a5   :  { %2644 = vmatpush1.bf16.msra.mxu0 %v4303_v32  ;;  %2890 = vmatpush1.bf16.msra.mxu1 %v4306_v33  ;;  %v4395_v32 = vld [vmem:[#allocation8 + $0x50] sm:$0xff]  }
 0x1a6   :  { %2645 = vmatprep.subr.bf16.mxu0 %v4311_v34  ;;  %2891 = vmatprep.subr.bf16.mxu1 %v4314_v35  ;;  %v4396_v33 = vld [vmem:[#allocation8 + $0xd0] sm:$0xff]  }
 0x1a7   :  { %v4397_v34 = vld [vmem:[#allocation8 + $0x10] sm:$0xff]  }
 0x1a8   :  { %v4398_v35 = vld [vmem:[#allocation8 + $0x90] sm:$0xff]  }
 0x1a9   :  { %2646 = vmatpush1.bf16.msra.mxu0 %v4309_v36  ;;  %2892 = vmatpush1.bf16.msra.mxu1 %v4312_v37  ;;  %v4399_v36 = vld [vmem:[#allocation8 + $0x58] sm:$0xff]  }
 0x1aa   :  { %2647 = vmatprep.subr.bf16.mxu0 %v4317_v38  ;;  %2893 = vmatprep.subr.bf16.mxu1 %v4320_v39  ;;  %v4400_v37 = vld [vmem:[#allocation8 + $0xd8] sm:$0xff]  }
 0x1ab   :  { %v4401_v38 = vld [vmem:[#allocation8 + $0x18] sm:$0xff]  }
 0x1ac   :  { %v4402_v39 = vld [vmem:[#allocation8 + $0x98] sm:$0xff]  }
 0x1ad   :  { %2648 = vmatpush1.bf16.msra.mxu0 %v4315_v40  ;;  %2894 = vmatpush1.bf16.msra.mxu1 %v4318_v41  ;;  %v4403_v40 = vld [vmem:[#allocation8 + $0x60] sm:$0xff]  }
 0x1ae   :  { %2649 = vmatprep.subr.bf16.mxu0 %v4323_v42  ;;  %2895 = vmatprep.subr.bf16.mxu1 %v4326_v43  ;;  %v4404_v41 = vld [vmem:[#allocation8 + $0xe0] sm:$0xff]  }
 0x1af   :  { %v4405_v42 = vld [vmem:[#allocation8 + $0x20] sm:$0xff]  }
 0x1b0   :  { %v4406_v43 = vld [vmem:[#allocation8 + $0xa0] sm:$0xff]  }
 0x1b1   :  { %2650 = vmatpush1.bf16.msra.mxu0 %v4321_v44  ;;  %2896 = vmatpush1.bf16.msra.mxu1 %v4324_v45  ;;  %v4407_v44 = vld [vmem:[#allocation8 + $0x68] sm:$0xff]  }
 0x1b2   :  { %2651 = vmatprep.subr.bf16.mxu0 %v4329_v46  ;;  %2897 = vmatprep.subr.bf16.mxu1 %v4332_v47  ;;  %v4408_v45 = vld [vmem:[#allocation8 + $0xe8] sm:$0xff]  }
 0x1b3   :  { %v4409_v46 = vld [vmem:[#allocation8 + $0x28] sm:$0xff]  }
 0x1b4   :  { %v4410_v47 = vld [vmem:[#allocation8 + $0xa8] sm:$0xff]  }
 0x1b5   :  { %2652 = vmatpush1.bf16.msra.mxu0 %v4327_v48  ;;  %2898 = vmatpush1.bf16.msra.mxu1 %v4330_v49  ;;  %v4411_v48 = vld [vmem:[#allocation8 + $0x70] sm:$0xff]  }
 0x1b6   :  { %2653 = vmatprep.subr.bf16.mxu0 %v4335_v50  ;;  %2899 = vmatprep.subr.bf16.mxu1 %v4338_v51  ;;  %v4412_v49 = vld [vmem:[#allocation8 + $0xf0] sm:$0xff]  }
 0x1b7   :  { %v4413_v50 = vld [vmem:[#allocation8 + $0x30] sm:$0xff]  }
 0x1b8   :  { %v4414_v51 = vld [vmem:[#allocation8 + $0xb0] sm:$0xff]  }
 0x1b9   :  { %2654 = vmatpush1.bf16.msra.mxu0 %v4333_v52  ;;  %2900 = vmatpush1.bf16.msra.mxu1 %v4336_v53  ;;  %v4415_v52 = vld [vmem:[#allocation8 + $0x78] sm:$0xff]  }
 0x1ba   :  { %2655 = vmatprep.subr.bf16.mxu0 %v4341_v54  ;;  %2901 = vmatprep.subr.bf16.mxu1 %v4344_v55  ;;  %v4416_v53 = vld [vmem:[#allocation8 + $0xf8] sm:$0xff]  }
 0x1bb   :  { %v4417_v54 = vld [vmem:[#allocation8 + $0x38] sm:$0xff]  }
 0x1bc   :  { %v4418_v55 = vld [vmem:[#allocation8 + $0xb8] sm:$0xff]  }
 0x1bd   :  { %2656 = vmatpush1.bf16.msra.mxu0 %v4339_v56  ;;  %2902 = vmatpush1.bf16.msra.mxu1 %v4342_v57  ;;  %v494_v56 = vlaneseq }
 0x1be   :  { %2657 = vmatprep.subr.bf16.mxu0 %v4347_v58  ;;  %2903 = vmatprep.subr.bf16.mxu1 %v4350_v59 }
 0x1bf   :  { %v495_v57 = vshrl.u32 %v494_v56, 7 }
 0x1c1   :  { %2658 = vmatpush1.bf16.msra.mxu0 %v4345_v60  ;;  %2904 = vmatpush1.bf16.msra.mxu1 %v4348_v61  ;;  %v496_v58 = vsub.s32 0, %v495_v57  ;;  %v504_v59 = vsub.s32 2, %v495_v57  ;;  %v492_v60 = vld [vmem:[#allocation7] sm:$0xf]  ;;  %v500_v61 = vsub.s32 1, %v495_v57 }
 0x1c2   :  { %2659 = vmatprep.subr.bf16.mxu0 %v4353_v62  ;;  %2905 = vmatprep.subr.bf16.mxu1 %v4356_v63  ;;  %v508_v62 = vsub.s32 3, %v495_v57 }
 0x1c3   :  { %v497_v63 = vrot.slane %v492_v60, %v496_v58 }
 0x1c5   :  { %2660 = vmatpush1.bf16.msra.mxu0 %v4351_v0  ;;  %2906 = vmatpush1.bf16.msra.mxu1 %v4354_v1  ;;  %v505_v0 = vrot.slane %v492_v60, %v504_v59  ;;  %v501_v1 = vrot.slane %v492_v60, %v500_v61 }
 0x1c6   :  { %2661 = vmatprep.subr.bf16.mxu0 %v4359_v2  ;;  %2907 = vmatprep.subr.bf16.mxu1 %v4362_v3  ;;  %v509_v2 = vrot.slane %v492_v60, %v508_v62 }
 0x1c9   :  { %2662 = vmatpush1.bf16.msra.mxu0 %v4357_v4  ;;  %2908 = vmatpush1.bf16.msra.mxu1 %v4360_v5 }
 0x1ca   :  { %2663 = vmatprep.subr.bf16.mxu0 %v4365_v6  ;;  %2909 = vmatprep.subr.bf16.mxu1 %v4368_v7 }
 0x1cd   :  { %2664 = vmatpush1.bf16.msra.mxu0 %v4363_v8  ;;  %2910 = vmatpush1.bf16.msra.mxu1 %v4366_v9 }
 0x1ce   :  { %2665 = vmatprep.subr.bf16.mxu0 %v4371_v10  ;;  %2911 = vmatprep.subr.bf16.mxu1 %v4374_v11 }
 0x1d1   :  { %2666 = vmatpush1.bf16.msra.mxu0 %v4369_v12  ;;  %2912 = vmatpush1.bf16.msra.mxu1 %v4372_v13 }
 0x1d2   :  { %2667 = vmatprep.subr.bf16.mxu0 %v4377_v14  ;;  %2913 = vmatprep.subr.bf16.mxu1 %v4380_v15 }
 0x1d5   :  { %2668 = vmatpush1.bf16.msra.mxu0 %v4375_v16  ;;  %2914 = vmatpush1.bf16.msra.mxu1 %v4378_v17 }
 0x1d6   :  { %2669 = vmatprep.subr.bf16.mxu0 %v4383_v18  ;;  %2915 = vmatprep.subr.bf16.mxu1 %v4386_v19 }
 0x1d9   :  { %2670 = vmatpush1.bf16.msra.mxu0 %v4381_v20  ;;  %2916 = vmatpush1.bf16.msra.mxu1 %v4384_v21 }
 0x1da   :  { %3713 = vmatprep.subr.bf16.mxu0 %v4387_v23  ;;  %3735 = vmatprep.subr.bf16.mxu1 %v4388_v24 }
 0x1dc   :  { %2672 = vmatmul.mubr.bf16.vlgmr.msra.gmra.mrb[0].mxu0 %v106_v25  ;;  %2918 = vmatmul.mubr.bf16.vlgmr.msra.gmra.mrb[0].mxu1 %v106_v25  ;;  %v3680_v25 = vld [vmem:[#allocation10] ss:$0 sm:$0xff] }
 0x1dd   :  { %3714 = vmatpush3.bf16.msra.mxu0 %v4389_v26  ;;  %3736 = vmatpush3.bf16.msra.mxu1 %v4390_v27 }
 0x1de   :  { %3715 = vmatprep.subr.bf16.mxu0 %v4391_v28  ;;  %3737 = vmatprep.subr.bf16.mxu1 %v4392_v29 }
 0x1e1   :  { %3716 = vmatpush3.bf16.msra.mxu0 %v4393_v30  ;;  %3738 = vmatpush3.bf16.msra.mxu1 %v4394_v31 }
 0x1e2   :  { %3717 = vmatprep.subr.bf16.mxu0 %v4395_v32  ;;  %3739 = vmatprep.subr.bf16.mxu1 %v4396_v33 }
 0x1e5   :  { %3718 = vmatpush3.bf16.msra.mxu0 %v4397_v34  ;;  %3740 = vmatpush3.bf16.msra.mxu1 %v4398_v35 }
 0x1e6   :  { %3719 = vmatprep.subr.bf16.mxu0 %v4399_v36  ;;  %3741 = vmatprep.subr.bf16.mxu1 %v4400_v37 }
 0x1e9   :  { %3720 = vmatpush3.bf16.msra.mxu0 %v4401_v38  ;;  %3742 = vmatpush3.bf16.msra.mxu1 %v4402_v39 }
 0x1ea   :  { %3721 = vmatprep.subr.bf16.mxu0 %v4403_v40  ;;  %3743 = vmatprep.subr.bf16.mxu1 %v4404_v41 }
 0x1ed   :  { %3722 = vmatpush3.bf16.msra.mxu0 %v4405_v42  ;;  %3744 = vmatpush3.bf16.msra.mxu1 %v4406_v43 }
 0x1ee   :  { %3723 = vmatprep.subr.bf16.mxu0 %v4407_v44  ;;  %3745 = vmatprep.subr.bf16.mxu1 %v4408_v45 }
 0x1f1   :  { %3724 = vmatpush3.bf16.msra.mxu0 %v4409_v46  ;;  %3746 = vmatpush3.bf16.msra.mxu1 %v4410_v47 }
 0x1f2   :  { %3725 = vmatprep.subr.bf16.mxu0 %v4411_v48  ;;  %3747 = vmatprep.subr.bf16.mxu1 %v4412_v49 }
 0x1f5   :  { %3726 = vmatpush3.bf16.msra.mxu0 %v4413_v50  ;;  %3748 = vmatpush3.bf16.msra.mxu1 %v4414_v51 }
 0x1f6   :  { %3727 = vmatprep.subr.bf16.mxu0 %v4415_v52  ;;  %3749 = vmatprep.subr.bf16.mxu1 %v4416_v53 }
 0x1f9   :  { %3728 = vmatpush3.bf16.msra.mxu0 %v4417_v54  ;;  %3750 = vmatpush3.bf16.msra.mxu1 %v4418_v55 }
 0x2af   :  { %v2673_v3 = vpop.f32.mrb[0].mxu0  ;;  %v2919_v4 = vpop.f32.mrb[0].mxu1 }
 0x2b0   :  { %v3757_v5 = vadd.f32 %v2673_v3, %v497_v63  ;;  %v3759_v6 = vadd.f32 %v2919_v4, %v505_v0  ;;  %v2675_v7 = vpop.f32.mrb[1].mxu0  ;;  %v2921_v8 = vpop.f32.mrb[1].mxu1 }
 0x2b1   :  { %v3758_v9 = vadd.f32 %v2675_v7, %v501_v1  ;;  %v3760_v10 = vadd.f32 %v2921_v8, %v509_v2  ;;  %v2677_v11 = vpop.f32.mrb[2].mxu0  ;;  %v2923_v12 = vpop.f32.mrb[2].mxu1 }
 0x2b2   :  { %4419 = vtanh.f32 %v3757_v5  ;;  %v2678_v13 = vpop.f32.mrb[3].mxu0  ;;  %v2924_v14 = vpop.f32.mrb[3].mxu1 }
 0x2b3   :  { %4421 = vtanh.f32 %v3759_v6 }
 0x2b4   :  { %4423 = vtanh.f32 %v3758_v9 }
 0x2b5   :  { %4425 = vtanh.f32 %v3760_v10 }
 0x2bc   :  { %v4420_v15 = vpop.eup %4419 }
 0x2bd   :  { %v4422_v16 = vpop.eup %4421  ;;  %v2930_v20 = vpack.c.bf16 %v4420_v15, %v4420_v15 }
 0x2be   :  { %v4424_v17 = vpop.eup %4423  ;;  %v2932_v22 = vpack.c.bf16 %v4422_v16, %v4422_v16 }
 0x2bf   :  { %v4426_v18 = vpop.eup %4425  ;;  %v2931_v19 = vpack.c.bf16 %v4424_v17, %v4424_v17 }
 0x2c0   :  { %v2933_v21 = vpack.c.bf16 %v4426_v18, %v4426_v18 }
 0x2c1   :  { %3229 = vmatprep.mubr.bf16.mxu0 %v2931_v19 }
 0x2c2   :  { %3269 = vmatprep.mubr.bf16.mxu1 %v2933_v21  ;;  %3230 = vmatmul.mubr.bf16.vlgmr.msra.gmra.mrb[4].mxu0 %v2930_v20 }
 0x2c3   :  { %3270 = vmatmul.mubr.bf16.vlgmr.msra.gmra.mrb[4].mxu1 %v2932_v22 }
 0x395   :  { %v3729_v23 = vpop.f32.mrb[4].mxu0 }
 0x396   :  { %v3751_v24 = vpop.f32.mrb[4].mxu1  ;;  %v3730_v26 = vpop.f32.mrb[5].mxu0 }
 0x397   :  { %v3731_v27 = vadd.f32 %v3730_v26, %v3729_v23  ;;  %v3752_v28 = vpop.f32.mrb[5].mxu1  ;;  %v3732_v29 = vpop.f32.mrb[6].mxu0 }
 0x398   :  { %v3753_v30 = vadd.f32 %v3752_v28, %v3751_v24  ;;  %v3754_v31 = vpop.f32.mrb[6].mxu1  ;;  %v3733_v32 = vpop.f32.mrb[7].mxu0 }
 0x399   :  { %v3232_v33 = vadd.f32 %v3731_v27, %v3680_v25  ;;  %v3755_v34 = vpop.f32.mrb[7].mxu1 }
 0x39b   :  { %v3272_v35 = vadd.f32 %v3753_v30, %v3232_v33 }
 0x39d   :  { %4427 = vtanh.f32 %v3272_v35 }
 0x3a7   :  { %v4428_v36 = vpop.eup %4427 }
 0x3a8   :  { %3278 = vst [vmem:[#allocation11] sm:$0xff] %v4428_v36 }
 0x3a9   :  { %4550 = shalt.err (!%p4547_p2)
}
 0x3aa   :  { %s4551_s6 = scalar_lea.hbm %s4686_s5, 128 }
 0x3ab   :  { %p4552_p3 = scmp.ne.s32.totalorder %s4686_s5, %s4551_s6  ;;  %p4555_p4 = scmp.lt.u32.totalorder %s4551_s6, %s4686_s5 }
 0x3ad   :  { %p4557_p5 = pnand %p4555_p4, %p4552_p3 }
 0x3af   :  { %4560 = shalt.err (!%p4557_p5)
}
 0x3b0   :  { %3288 = dma.vmem_to_hbm [thread:$0]  %s3286_s28, 128, %s4686_s5, [#allocation4]  }
 0x3b1   :  { %4567 = dma.done.wait [#allocation4], 128  }
 0x3b2   :  { %4568 = vsyncadd [#allocation4], 4294967168 }
 0x3b3   :  { %3292 = vsyncpa [#allocation3], 1 }
 0x3b4   :  { %3293 = vsyncpa [#allocation6], 1 }
 0x3b5   :  { %3294 = vsyncpa [#allocation9], 1 }
 0x3b6   :  { %3295 = vsyncpa [#allocation4], 1 }

</bundles_post_ra>
